<compile_context>
chip_gen: v7x
topology: tpu7x:2x2x1
jax: 0.10.0
libtpu: 0.0.40
codegen_flags: <defaults>
</compile_context>

<pallas_src>
import jax
import jax.numpy as jnp
from jax import lax
from jax.experimental import pallas as pl
from jax.experimental.pallas import tpu as pltpu

LRELU_SLOPE = 0.1
KERNEL_SIZE = 3
DILATIONS = (1, 3, 5)
HALO = 128  # one-sided, lane-aligned halo

# Cumulative one-sided receptive field of the whole block (12 samples) plus the
# worst-case cyclic-roll wrap (max dilation).  The halo must cover it so that
# wrapped / out-of-tile lanes can never contaminate the centre block.
_RECEPTIVE = (KERNEL_SIZE // 2) * sum(d + 1 for d in DILATIONS)
assert HALO >= _RECEPTIVE + max(DILATIONS), "HALO too small for receptive field"


def _leaky_relu(x):
    return jnp.where(x >= 0, x, LRELU_SLOPE * x)


def _round_up(v, m):
    return (v + m - 1) // m * m


def _device_defaults():
    """(default t_block, vmem_limit_bytes) tuned per TPU generation."""
    kind = ""
    try:
        kind = jax.devices()[0].device_kind.lower()
    except Exception:
        pass
    big_vmem = ("v5" in kind) or ("v6" in kind)      # 128 MiB VMEM parts
    t_block = 2048 if big_vmem else 1024             # v7x: only 64 MiB VMEM
    try:
        cap = getattr(pltpu.get_tpu_info(), "vmem_capacity_bytes", None)
    except Exception:
        cap = None
    if cap is None:
        cap = (128 if big_vmem else 64) * 1024 * 1024
    return t_block, int(cap * 3 // 4)                # leave compiler headroom


def _make_kernel(T, t_block, compute_dtype, fold):
    text = t_block + 2 * HALO  # width of the extended (haloed) tile

    def shift(x, s):
        # result[:, i] = x[:, (i + s) % text]: XLU lane rotate.  Wrapped lanes
        # only ever land inside the >=111-lane halo slack and are never
        # consumed by the centre block.
        return pltpu.roll(x, (-s) % text, axis=1)

    def conv(x, w_ref, b_ref, i, d):
        # leaky_relu -> dilated K=3 conv as MXU matmul(s) with f32 accumulation.
        xa = _leaky_relu(x).astype(compute_dtype)
        if fold:
            # Small C: fold the 3 taps into one 3C-deep contraction.
            xs = jnp.concatenate([shift(xa, -d), xa, shift(xa, d)], axis=0)
            y = jnp.dot(w_ref[i], xs, preferred_element_type=jnp.float32)
        else:
            # Large C: 3 accumulated dots; avoids the (3C, text) intermediate.
            y = jnp.dot(w_ref[i, 0], shift(xa, -d),
                        preferred_element_type=jnp.float32)
            y = y + jnp.dot(w_ref[i, 1], xa,
                            preferred_element_type=jnp.float32)
            y = y + jnp.dot(w_ref[i, 2], shift(xa, d),
                            preferred_element_type=jnp.float32)
        return y + b_ref[i]

    def kernel(lh_ref, xc_ref, rh_ref, w1_ref, b1_ref, w2_ref, b2_ref, o_ref):
        t = pl.program_id(1)

        # Global time position of every lane of the extended tile, as a
        # (1, text) row broadcast over channels inside jnp.where.  Lanes whose
        # position falls outside [0, T) are forced to zero so every conv sees
        # the same zero padding as PyTorch at the sequence boundaries (the
        # halo DMAs are clamped in-bounds, so those lanes hold unrelated data).
        pos = t * t_block - HALO + lax.broadcasted_iota(jnp.int32, (1, text), 1)
        valid = jnp.logical_and(pos >= 0, pos < T)

        # Extended tile = [left halo | centre block | right halo].
        x = jnp.concatenate([lh_ref[0], xc_ref[0], rh_ref[0]], axis=1)
        x = jnp.where(valid, x.astype(jnp.float32), 0.0)

        for i, d in enumerate(DILATIONS):
            xt = conv(x, w1_ref, b1_ref, i, d)
            xt = jnp.where(valid, xt, 0.0)
            xt = conv(xt, w2_ref, b2_ref, i, 1)
            xt = jnp.where(valid, xt, 0.0)
            x = xt + x

        o_ref[0] = x[:, HALO:HALO + t_block].astype(o_ref.dtype)

    return kernel


def resblock1_pallas(x, w1, b1, w2, b2, *, t_block=None,
                     compute_dtype=jnp.bfloat16, fold_taps=None):
    """ResBlock1 forward.

    x      : (B, C, T) float32, NCT layout.
    w1, w2 : (3, C, C, K) conv weights (torch (C_out, C_in, K) layout) for the
             three dilated convs / three dilation-1 convs.
    b1, b2 : (3, C) biases.
    """
    B, C, T = x.shape
    K = w1.shape[-1]
    assert K == KERNEL_SIZE
    packing = 4 // jnp.dtype(compute_dtype).itemsize
    assert C % (8 * packing) == 0, (
        f"C={C} must be a multiple of {8 * packing} for "
        f"{jnp.dtype(compute_dtype).name} operands")

    default_tb, vmem_limit = _device_defaults()
    if t_block is None:
        t_block = default_tb
    t_block = max(HALO, min(_round_up(t_block, HALO), _round_up(T, HALO)))
    n_t = pl.cdiv(T, t_block)
    if B * n_t < 2 and T > HALO:
        # v7x has 2 TensorCores per chip: keep >= 2 parallel grid points.
        t_block = max(HALO, _round_up(pl.cdiv(T, 2), HALO))
        n_t = pl.cdiv(T, t_block)
    tb = t_block // HALO           # t_block in units of 128-lane halo blocks
    n_halo = pl.cdiv(T, HALO)      # number of halo-sized blocks in the input

    if fold_taps is None:
        fold_taps = C < 128  # fold taps only while C alone underfills the MXU

    cdt = compute_dtype
    if fold_taps:
        # (3, C, C, K) -> (3, C, K*C): taps folded into the contraction axis.
        def pack(w):
            return jnp.concatenate([w[..., k] for k in range(K)],
                                   axis=-1).astype(cdt)
    else:
        # (3, C, C, K) -> (3, K, C, C): one (C_out, C_in) matrix per tap.
        def pack(w):
            return jnp.moveaxis(w, -1, 1).astype(cdt)

    w1p, w2p = pack(w1), pack(w2)
    b1p = b1[..., None].astype(jnp.float32)
    b2p = b2[..., None].astype(jnp.float32)

    def full_spec(a):
        # Resident (constant-index) weight/bias streams, DMA'd once.
        # TODO(synk): single-buffer these via pipeline_mode=pl.Buffered(1) once
        # validated on the target jax version (pure VMEM saving for large C).
        return pl.BlockSpec(a.shape, lambda b, t, _nd=a.ndim: (0,) * _nd)

    grid_spec = pltpu.PrefetchScalarGridSpec(
        num_scalar_prefetch=0,
        grid=(B, n_t),
        in_specs=[
            # Left halo / centre / right halo views of the *unpadded* input.
            # Halo block indices are clamped in-bounds; lanes whose nominal
            # position is outside [0, T) are zeroed in-kernel, so no host-side
            # padding (and no extra HBM round trip) is needed.
            pl.BlockSpec((1, C, HALO),
                         lambda b, t: (b, 0, jnp.maximum(t * tb - 1, 0))),
            pl.BlockSpec((1, C, t_block), lambda b, t: (b, 0, t)),
            pl.BlockSpec((1, C, HALO),
                         lambda b, t: (b, 0,
                                       jnp.minimum((t + 1) * tb, n_halo - 1))),
            full_spec(w1p), full_spec(b1p), full_spec(w2p), full_spec(b2p),
        ],
        out_specs=pl.BlockSpec((1, C, t_block), lambda b, t: (b, 0, t)),
    )

    return pl.pallas_call(
        _make_kernel(T, t_block, compute_dtype, fold_taps),
        out_shape=jax.ShapeDtypeStruct((B, C, T), x.dtype),
        grid_spec=grid_spec,
        compiler_params=pltpu.CompilerParams(
            dimension_semantics=("parallel", "parallel"),
            vmem_limit_bytes=vmem_limit),
    )(x, x, x, w1p, b1p, w2p, b2p)


# ---------------- pure-JAX reference (for correctness check) ----------------

def _conv1d_ref(x, w_oik, b, d):
    y = lax.conv_general_dilated(
        x, w_oik, window_strides=(1,), padding=[(d, d)],
        rhs_dilation=(d,), dimension_numbers=("NCH", "OIH", "NCH"))
    return y + b[None, :, None]


def resblock1_ref(x, w1, b1, w2, b2):
    for i, d in enumerate(DILATIONS):
        xt = _leaky_relu(x)
        xt = _conv1d_ref(xt, w1[i], b1[i], d)
        xt = _leaky_relu(xt)
        xt = _conv1d_ref(xt, w2[i], b2[i], 1)
        x = xt + x
    return x


if __name__ == "__main__":
    key = jax.random.PRNGKey(0)
    B, C, T = 2, 32, 320          # T deliberately not a multiple of the tile
    kx, kw1, kb1, kw2, kb2 = jax.random.split(key, 5)

    x = jax.random.normal(kx, (B, C, T), jnp.float32)
    # init_weights: conv weights ~ N(0, 0.01); biases ~ torch default uniform.
    # (weight_norm at init is the identity reparameterization.)
    w1 = 0.01 * jax.random.normal(kw1, (3, C, C, KERNEL_SIZE), jnp.float32)
    w2 = 0.01 * jax.random.normal(kw2, (3, C, C, KERNEL_SIZE), jnp.float32)
    bound = 1.0 / (C * KERNEL_SIZE) ** 0.5
    b1 = jax.random.uniform(kb1, (3, C), jnp.float32, -bound, bound)
    b2 = jax.random.uniform(kb2, (3, C), jnp.float32, -bound, bound)

    ref = resblock1_ref(x, w1, b1, w2, b2)

    # 1) multi-tile folded path (3 time tiles: clamped halos + boundary
    #    masking), f32 compute for an exact structural check.
    out_f32 = jax.block_until_ready(
        resblock1_pallas(x, w1, b1, w2, b2, t_block=128,
                         compute_dtype=jnp.float32))
    err32 = float(jnp.max(jnp.abs(out_f32 - ref)))
    assert jnp.allclose(out_f32, ref, atol=1e-4, rtol=1e-4), f"f32 err {err32}"

    # 2) unfolded (large-C style) path: 3 accumulated dots per conv.
    out_unf = jax.block_until_ready(
        resblock1_pallas(x, w1, b1, w2, b2, t_block=256,
                         compute_dtype=jnp.float32, fold_taps=False))
    erru = float(jnp.max(jnp.abs(out_unf - ref)))
    assert jnp.allclose(out_unf, ref, atol=1e-4, rtol=1e-4), f"unfold err {erru}"

    # 3) default deployment path: generation-tuned tile, bf16 MXU operands
    #    with f32 accumulation.
    out_bf16 = jax.block_until_ready(resblock1_pallas(x, w1, b1, w2, b2))
    err16 = float(jnp.max(jnp.abs(out_bf16 - ref)))
    assert jnp.allclose(out_bf16, ref, atol=2e-2, rtol=2e-2), f"bf16 err {err16}"

    print("KERNEL_OK")
</pallas_src>

<mosaic_0001>
module attributes {stable_mosaic.version = 11 : i64} {
  func.func @kernel(%arg0: i32, %arg1: i32, %arg2: memref<1x32x128xf32, #tpu.memory_space<vmem>>, %arg3: memref<1x32x128xf32, #tpu.memory_space<vmem>>, %arg4: memref<1x32x128xf32, #tpu.memory_space<vmem>>, %arg5: memref<3x32x96xf32, #tpu.memory_space<vmem>>, %arg6: memref<3x32x1xf32, #tpu.memory_space<vmem>>, %arg7: memref<3x32x96xf32, #tpu.memory_space<vmem>>, %arg8: memref<3x32x1xf32, #tpu.memory_space<vmem>>, %arg9: memref<1x32x128xf32, #tpu.memory_space<vmem>>) attributes {dimension_semantics = [#tpu.dimension_semantics<parallel>, #tpu.dimension_semantics<parallel>], iteration_bounds = array<i64: 2, 3>, scalar_prefetch = 0 : i64, scratch_operands = 0 : i64, tpu.core_type = #tpu.core_type<tc>, window_params = [{transform_indices = @transform_0, window_bounds = array<i64: 1, 32, 128>}, {transform_indices = @transform_1, window_bounds = array<i64: 1, 32, 128>}, {transform_indices = @transform_2, window_bounds = array<i64: 1, 32, 128>}, {pipeline_mode = #tpu.pipeline_mode<synchronous>, transform_indices = @transform_3, window_bounds = array<i64: 3, 32, 96>}, {pipeline_mode = #tpu.pipeline_mode<synchronous>, transform_indices = @transform_4, window_bounds = array<i64: 3, 32, 1>}, {pipeline_mode = #tpu.pipeline_mode<synchronous>, transform_indices = @transform_5, window_bounds = array<i64: 3, 32, 96>}, {pipeline_mode = #tpu.pipeline_mode<synchronous>, transform_indices = @transform_6, window_bounds = array<i64: 3, 32, 1>}, {transform_indices = @transform_7, window_bounds = array<i64: 1, 32, 128>}]} {
    %c128_i32 = arith.constant 128 : i32
    %0 = arith.muli %arg1, %c128_i32 : i32
    %c128_i32_0 = arith.constant 128 : i32
    %1 = arith.subi %0, %c128_i32_0 : i32
    %2 = tpu.iota {dimensions = array<i32: 1>} : vector<1x384xi32>
    %3 = vector.broadcast %1 : i32 to vector<1x384xi32>
    %4 = arith.addi %3, %2 : vector<1x384xi32>
    %c0_i32 = arith.constant 0 : i32
    %5 = vector.broadcast %c0_i32 : i32 to vector<1x384xi32>
    %6 = arith.cmpi sge, %4, %5 : vector<1x384xi32>
    %c320_i32 = arith.constant 320 : i32
    %7 = vector.broadcast %c320_i32 : i32 to vector<1x384xi32>
    %8 = arith.cmpi slt, %4, %7 : vector<1x384xi32>
    %9 = arith.andi %6, %8 : vector<1x384xi1>
    %c0 = arith.constant 0 : index
    %c0_1 = arith.constant 0 : index
    %c0_2 = arith.constant 0 : index
    %10 = vector.load %arg2[%c0, %c0_1, %c0_2] : memref<1x32x128xf32, #tpu.memory_space<vmem>>, vector<1x32x128xf32>
    %11 = vector.shape_cast %10 : vector<1x32x128xf32> to vector<32x128xf32>
    %c0_3 = arith.constant 0 : index
    %c0_4 = arith.constant 0 : index
    %c0_5 = arith.constant 0 : index
    %12 = vector.load %arg3[%c0_3, %c0_4, %c0_5] : memref<1x32x128xf32, #tpu.memory_space<vmem>>, vector<1x32x128xf32>
    %13 = vector.shape_cast %12 : vector<1x32x128xf32> to vector<32x128xf32>
    %c0_6 = arith.constant 0 : index
    %c0_7 = arith.constant 0 : index
    %c0_8 = arith.constant 0 : index
    %14 = vector.load %arg4[%c0_6, %c0_7, %c0_8] : memref<1x32x128xf32, #tpu.memory_space<vmem>>, vector<1x32x128xf32>
    %15 = vector.shape_cast %14 : vector<1x32x128xf32> to vector<32x128xf32>
    %16 = tpu.concatenate %11, %13, %15 in 1 : vector<32x128xf32>, vector<32x128xf32>, vector<32x128xf32> -> vector<32x384xf32>
    %cst = arith.constant 0.000000e+00 : f32
    %17 = vector.shape_cast %9 : vector<1x384xi1> to vector<1x384xi1>
    %18 = vector.broadcast %17 : vector<1x384xi1> to vector<32x384xi1>
    %19 = vector.broadcast %cst : f32 to vector<32x384xf32>
    %20 = arith.select %18, %16, %19 : vector<32x384xi1>, vector<32x384xf32>
    %cst_9 = arith.constant 0.000000e+00 : f32
    %21 = vector.broadcast %cst_9 : f32 to vector<32x384xf32>
    %22 = arith.cmpf oge, %20, %21 : vector<32x384xf32>
    %cst_10 = arith.constant 1.000000e-01 : f32
    %23 = vector.broadcast %cst_10 : f32 to vector<32x384xf32>
    %24 = arith.mulf %23, %20 : vector<32x384xf32>
    %25 = arith.select %22, %20, %24 : vector<32x384xi1>, vector<32x384xf32>
    %c1_i32 = arith.constant 1 : i32
    %26 = tpu.dynamic_rotate %25 by %c1_i32 dim 1 : vector<32x384xf32>, i32 -> vector<32x384xf32>
    %c383_i32 = arith.constant 383 : i32
    %27 = tpu.dynamic_rotate %25 by %c383_i32 dim 1 : vector<32x384xf32>, i32 -> vector<32x384xf32>
    %28 = tpu.concatenate %26, %25, %27 in 0 : vector<32x384xf32>, vector<32x384xf32>, vector<32x384xf32> -> vector<96x384xf32>
    %c0_11 = arith.constant 0 : index
    %c0_12 = arith.constant 0 : index
    %c0_13 = arith.constant 0 : index
    %29 = vector.load %arg5[%c0_11, %c0_12, %c0_13] : memref<3x32x96xf32, #tpu.memory_space<vmem>>, vector<1x32x96xf32>
    %30 = vector.shape_cast %29 : vector<1x32x96xf32> to vector<32x96xf32>
    %cst_14 = arith.constant dense<0.000000e+00> : vector<32x384xf32>
    %31 = tpu.matmul %30, %28, %cst_14 {dimension_numbers = #tpu.dot_dimension_numbers<[1], [0], [0], [1], [0, 0, 1, 1], [], []>} : vector<32x96xf32>, vector<96x384xf32>, vector<32x384xf32> -> vector<32x384xf32>
    %c0_15 = arith.constant 0 : index
    %c0_16 = arith.constant 0 : index
    %c0_17 = arith.constant 0 : index
    %32 = vector.load %arg6[%c0_15, %c0_16, %c0_17] : memref<3x32x1xf32, #tpu.memory_space<vmem>>, vector<1x32x1xf32>
    %33 = vector.shape_cast %32 : vector<1x32x1xf32> to vector<32x1xf32>
    %34 = vector.broadcast %33 : vector<32x1xf32> to vector<32x384xf32>
    %35 = arith.addf %31, %34 : vector<32x384xf32>
    %cst_18 = arith.constant 0.000000e+00 : f32
    %36 = vector.shape_cast %9 : vector<1x384xi1> to vector<1x384xi1>
    %37 = vector.broadcast %36 : vector<1x384xi1> to vector<32x384xi1>
    %38 = vector.broadcast %cst_18 : f32 to vector<32x384xf32>
    %39 = arith.select %37, %35, %38 : vector<32x384xi1>, vector<32x384xf32>
    %cst_19 = arith.constant 0.000000e+00 : f32
    %40 = vector.broadcast %cst_19 : f32 to vector<32x384xf32>
    %41 = arith.cmpf oge, %39, %40 : vector<32x384xf32>
    %cst_20 = arith.constant 1.000000e-01 : f32
    %42 = vector.broadcast %cst_20 : f32 to vector<32x384xf32>
    %43 = arith.mulf %42, %39 : vector<32x384xf32>
    %44 = arith.select %41, %39, %43 : vector<32x384xi1>, vector<32x384xf32>
    %c1_i32_21 = arith.constant 1 : i32
    %45 = tpu.dynamic_rotate %44 by %c1_i32_21 dim 1 : vector<32x384xf32>, i32 -> vector<32x384xf32>
    %c383_i32_22 = arith.constant 383 : i32
    %46 = tpu.dynamic_rotate %44 by %c383_i32_22 dim 1 : vector<32x384xf32>, i32 -> vector<32x384xf32>
    %47 = tpu.concatenate %45, %44, %46 in 0 : vector<32x384xf32>, vector<32x384xf32>, vector<32x384xf32> -> vector<96x384xf32>
    %c0_23 = arith.constant 0 : index
    %c0_24 = arith.constant 0 : index
    %c0_25 = arith.constant 0 : index
    %48 = vector.load %arg7[%c0_23, %c0_24, %c0_25] : memref<3x32x96xf32, #tpu.memory_space<vmem>>, vector<1x32x96xf32>
    %49 = vector.shape_cast %48 : vector<1x32x96xf32> to vector<32x96xf32>
    %cst_26 = arith.constant dense<0.000000e+00> : vector<32x384xf32>
    %50 = tpu.matmul %49, %47, %cst_26 {dimension_numbers = #tpu.dot_dimension_numbers<[1], [0], [0], [1], [0, 0, 1, 1], [], []>} : vector<32x96xf32>, vector<96x384xf32>, vector<32x384xf32> -> vector<32x384xf32>
    %c0_27 = arith.constant 0 : index
    %c0_28 = arith.constant 0 : index
    %c0_29 = arith.constant 0 : index
    %51 = vector.load %arg8[%c0_27, %c0_28, %c0_29] : memref<3x32x1xf32, #tpu.memory_space<vmem>>, vector<1x32x1xf32>
    %52 = vector.shape_cast %51 : vector<1x32x1xf32> to vector<32x1xf32>
    %53 = vector.broadcast %52 : vector<32x1xf32> to vector<32x384xf32>
    %54 = arith.addf %50, %53 : vector<32x384xf32>
    %cst_30 = arith.constant 0.000000e+00 : f32
    %55 = vector.shape_cast %9 : vector<1x384xi1> to vector<1x384xi1>
    %56 = vector.broadcast %55 : vector<1x384xi1> to vector<32x384xi1>
    %57 = vector.broadcast %cst_30 : f32 to vector<32x384xf32>
    %58 = arith.select %56, %54, %57 : vector<32x384xi1>, vector<32x384xf32>
    %59 = arith.addf %58, %20 : vector<32x384xf32>
    %cst_31 = arith.constant 0.000000e+00 : f32
    %60 = vector.broadcast %cst_31 : f32 to vector<32x384xf32>
    %61 = arith.cmpf oge, %59, %60 : vector<32x384xf32>
    %cst_32 = arith.constant 1.000000e-01 : f32
    %62 = vector.broadcast %cst_32 : f32 to vector<32x384xf32>
    %63 = arith.mulf %62, %59 : vector<32x384xf32>
    %64 = arith.select %61, %59, %63 : vector<32x384xi1>, vector<32x384xf32>
    %c3_i32 = arith.constant 3 : i32
    %65 = tpu.dynamic_rotate %64 by %c3_i32 dim 1 : vector<32x384xf32>, i32 -> vector<32x384xf32>
    %c381_i32 = arith.constant 381 : i32
    %66 = tpu.dynamic_rotate %64 by %c381_i32 dim 1 : vector<32x384xf32>, i32 -> vector<32x384xf32>
    %67 = tpu.concatenate %65, %64, %66 in 0 : vector<32x384xf32>, vector<32x384xf32>, vector<32x384xf32> -> vector<96x384xf32>
    %c1 = arith.constant 1 : index
    %c0_33 = arith.constant 0 : index
    %c0_34 = arith.constant 0 : index
    %68 = vector.load %arg5[%c1, %c0_33, %c0_34] : memref<3x32x96xf32, #tpu.memory_space<vmem>>, vector<1x32x96xf32>
    %69 = vector.shape_cast %68 : vector<1x32x96xf32> to vector<32x96xf32>
    %cst_35 = arith.constant dense<0.000000e+00> : vector<32x384xf32>
    %70 = tpu.matmul %69, %67, %cst_35 {dimension_numbers = #tpu.dot_dimension_numbers<[1], [0], [0], [1], [0, 0, 1, 1], [], []>} : vector<32x96xf32>, vector<96x384xf32>, vector<32x384xf32> -> vector<32x384xf32>
    %c1_36 = arith.constant 1 : index
    %c0_37 = arith.constant 0 : index
    %c0_38 = arith.constant 0 : index
    %71 = vector.load %arg6[%c1_36, %c0_37, %c0_38] : memref<3x32x1xf32, #tpu.memory_space<vmem>>, vector<1x32x1xf32>
    %72 = vector.shape_cast %71 : vector<1x32x1xf32> to vector<32x1xf32>
    %73 = vector.broadcast %72 : vector<32x1xf32> to vector<32x384xf32>
    %74 = arith.addf %70, %73 : vector<32x384xf32>
    %cst_39 = arith.constant 0.000000e+00 : f32
    %75 = vector.shape_cast %9 : vector<1x384xi1> to vector<1x384xi1>
    %76 = vector.broadcast %75 : vector<1x384xi1> to vector<32x384xi1>
    %77 = vector.broadcast %cst_39 : f32 to vector<32x384xf32>
    %78 = arith.select %76, %74, %77 : vector<32x384xi1>, vector<32x384xf32>
    %cst_40 = arith.constant 0.000000e+00 : f32
    %79 = vector.broadcast %cst_40 : f32 to vector<32x384xf32>
    %80 = arith.cmpf oge, %78, %79 : vector<32x384xf32>
    %cst_41 = arith.constant 1.000000e-01 : f32
    %81 = vector.broadcast %cst_41 : f32 to vector<32x384xf32>
    %82 = arith.mulf %81, %78 : vector<32x384xf32>
    %83 = arith.select %80, %78, %82 : vector<32x384xi1>, vector<32x384xf32>
    %c1_i32_42 = arith.constant 1 : i32
    %84 = tpu.dynamic_rotate %83 by %c1_i32_42 dim 1 : vector<32x384xf32>, i32 -> vector<32x384xf32>
    %c383_i32_43 = arith.constant 383 : i32
    %85 = tpu.dynamic_rotate %83 by %c383_i32_43 dim 1 : vector<32x384xf32>, i32 -> vector<32x384xf32>
    %86 = tpu.concatenate %84, %83, %85 in 0 : vector<32x384xf32>, vector<32x384xf32>, vector<32x384xf32> -> vector<96x384xf32>
    %c1_44 = arith.constant 1 : index
    %c0_45 = arith.constant 0 : index
    %c0_46 = arith.constant 0 : index
    %87 = vector.load %arg7[%c1_44, %c0_45, %c0_46] : memref<3x32x96xf32, #tpu.memory_space<vmem>>, vector<1x32x96xf32>
    %88 = vector.shape_cast %87 : vector<1x32x96xf32> to vector<32x96xf32>
    %cst_47 = arith.constant dense<0.000000e+00> : vector<32x384xf32>
    %89 = tpu.matmul %88, %86, %cst_47 {dimension_numbers = #tpu.dot_dimension_numbers<[1], [0], [0], [1], [0, 0, 1, 1], [], []>} : vector<32x96xf32>, vector<96x384xf32>, vector<32x384xf32> -> vector<32x384xf32>
    %c1_48 = arith.constant 1 : index
    %c0_49 = arith.constant 0 : index
    %c0_50 = arith.constant 0 : index
    %90 = vector.load %arg8[%c1_48, %c0_49, %c0_50] : memref<3x32x1xf32, #tpu.memory_space<vmem>>, vector<1x32x1xf32>
    %91 = vector.shape_cast %90 : vector<1x32x1xf32> to vector<32x1xf32>
    %92 = vector.broadcast %91 : vector<32x1xf32> to vector<32x384xf32>
    %93 = arith.addf %89, %92 : vector<32x384xf32>
    %cst_51 = arith.constant 0.000000e+00 : f32
    %94 = vector.shape_cast %9 : vector<1x384xi1> to vector<1x384xi1>
    %95 = vector.broadcast %94 : vector<1x384xi1> to vector<32x384xi1>
    %96 = vector.broadcast %cst_51 : f32 to vector<32x384xf32>
    %97 = arith.select %95, %93, %96 : vector<32x384xi1>, vector<32x384xf32>
    %98 = arith.addf %97, %59 : vector<32x384xf32>
    %cst_52 = arith.constant 0.000000e+00 : f32
    %99 = vector.broadcast %cst_52 : f32 to vector<32x384xf32>
    %100 = arith.cmpf oge, %98, %99 : vector<32x384xf32>
    %cst_53 = arith.constant 1.000000e-01 : f32
    %101 = vector.broadcast %cst_53 : f32 to vector<32x384xf32>
    %102 = arith.mulf %101, %98 : vector<32x384xf32>
    %103 = arith.select %100, %98, %102 : vector<32x384xi1>, vector<32x384xf32>
    %c5_i32 = arith.constant 5 : i32
    %104 = tpu.dynamic_rotate %103 by %c5_i32 dim 1 : vector<32x384xf32>, i32 -> vector<32x384xf32>
    %c379_i32 = arith.constant 379 : i32
    %105 = tpu.dynamic_rotate %103 by %c379_i32 dim 1 : vector<32x384xf32>, i32 -> vector<32x384xf32>
    %106 = tpu.concatenate %104, %103, %105 in 0 : vector<32x384xf32>, vector<32x384xf32>, vector<32x384xf32> -> vector<96x384xf32>
    %c2 = arith.constant 2 : index
    %c0_54 = arith.constant 0 : index
    %c0_55 = arith.constant 0 : index
    %107 = vector.load %arg5[%c2, %c0_54, %c0_55] : memref<3x32x96xf32, #tpu.memory_space<vmem>>, vector<1x32x96xf32>
    %108 = vector.shape_cast %107 : vector<1x32x96xf32> to vector<32x96xf32>
    %cst_56 = arith.constant dense<0.000000e+00> : vector<32x384xf32>
    %109 = tpu.matmul %108, %106, %cst_56 {dimension_numbers = #tpu.dot_dimension_numbers<[1], [0], [0], [1], [0, 0, 1, 1], [], []>} : vector<32x96xf32>, vector<96x384xf32>, vector<32x384xf32> -> vector<32x384xf32>
    %c2_57 = arith.constant 2 : index
    %c0_58 = arith.constant 0 : index
    %c0_59 = arith.constant 0 : index
    %110 = vector.load %arg6[%c2_57, %c0_58, %c0_59] : memref<3x32x1xf32, #tpu.memory_space<vmem>>, vector<1x32x1xf32>
    %111 = vector.shape_cast %110 : vector<1x32x1xf32> to vector<32x1xf32>
    %112 = vector.broadcast %111 : vector<32x1xf32> to vector<32x384xf32>
    %113 = arith.addf %109, %112 : vector<32x384xf32>
    %cst_60 = arith.constant 0.000000e+00 : f32
    %114 = vector.shape_cast %9 : vector<1x384xi1> to vector<1x384xi1>
    %115 = vector.broadcast %114 : vector<1x384xi1> to vector<32x384xi1>
    %116 = vector.broadcast %cst_60 : f32 to vector<32x384xf32>
    %117 = arith.select %115, %113, %116 : vector<32x384xi1>, vector<32x384xf32>
    %cst_61 = arith.constant 0.000000e+00 : f32
    %118 = vector.broadcast %cst_61 : f32 to vector<32x384xf32>
    %119 = arith.cmpf oge, %117, %118 : vector<32x384xf32>
    %cst_62 = arith.constant 1.000000e-01 : f32
    %120 = vector.broadcast %cst_62 : f32 to vector<32x384xf32>
    %121 = arith.mulf %120, %117 : vector<32x384xf32>
    %122 = arith.select %119, %117, %121 : vector<32x384xi1>, vector<32x384xf32>
    %c1_i32_63 = arith.constant 1 : i32
    %123 = tpu.dynamic_rotate %122 by %c1_i32_63 dim 1 : vector<32x384xf32>, i32 -> vector<32x384xf32>
    %c383_i32_64 = arith.constant 383 : i32
    %124 = tpu.dynamic_rotate %122 by %c383_i32_64 dim 1 : vector<32x384xf32>, i32 -> vector<32x384xf32>
    %125 = tpu.concatenate %123, %122, %124 in 0 : vector<32x384xf32>, vector<32x384xf32>, vector<32x384xf32> -> vector<96x384xf32>
    %c2_65 = arith.constant 2 : index
    %c0_66 = arith.constant 0 : index
    %c0_67 = arith.constant 0 : index
    %126 = vector.load %arg7[%c2_65, %c0_66, %c0_67] : memref<3x32x96xf32, #tpu.memory_space<vmem>>, vector<1x32x96xf32>
    %127 = vector.shape_cast %126 : vector<1x32x96xf32> to vector<32x96xf32>
    %cst_68 = arith.constant dense<0.000000e+00> : vector<32x384xf32>
    %128 = tpu.matmul %127, %125, %cst_68 {dimension_numbers = #tpu.dot_dimension_numbers<[1], [0], [0], [1], [0, 0, 1, 1], [], []>} : vector<32x96xf32>, vector<96x384xf32>, vector<32x384xf32> -> vector<32x384xf32>
    %c2_69 = arith.constant 2 : index
    %c0_70 = arith.constant 0 : index
    %c0_71 = arith.constant 0 : index
    %129 = vector.load %arg8[%c2_69, %c0_70, %c0_71] : memref<3x32x1xf32, #tpu.memory_space<vmem>>, vector<1x32x1xf32>
    %130 = vector.shape_cast %129 : vector<1x32x1xf32> to vector<32x1xf32>
    %131 = vector.broadcast %130 : vector<32x1xf32> to vector<32x384xf32>
    %132 = arith.addf %128, %131 : vector<32x384xf32>
    %cst_72 = arith.constant 0.000000e+00 : f32
    %133 = vector.shape_cast %9 : vector<1x384xi1> to vector<1x384xi1>
    %134 = vector.broadcast %133 : vector<1x384xi1> to vector<32x384xi1>
    %135 = vector.broadcast %cst_72 : f32 to vector<32x384xf32>
    %136 = arith.select %134, %132, %135 : vector<32x384xi1>, vector<32x384xf32>
    %137 = arith.addf %136, %98 : vector<32x384xf32>
    %138 = vector.extract_strided_slice %137 {offsets = [0, 128], sizes = [32, 128], strides = [1, 1]} : vector<32x384xf32> to vector<32x128xf32>
    %c0_73 = arith.constant 0 : index
    %c0_74 = arith.constant 0 : index
    %c0_75 = arith.constant 0 : index
    %139 = vector.load %arg9[%c0_73, %c0_74, %c0_75] : memref<1x32x128xf32, #tpu.memory_space<vmem>>, vector<1x32x128xf32>
    %140 = vector.shape_cast %139 : vector<1x32x128xf32> to vector<32x128xf32>
    %141 = vector.shape_cast %138 : vector<32x128xf32> to vector<1x32x128xf32>
    tpu.vector_store %arg9[%c0_73, %c0_74, %c0_75], %141 {strides = array<i32>} : memref<1x32x128xf32, #tpu.memory_space<vmem>>, vector<1x32x128xf32>,
    return
  }
  func.func @transform_0(%arg0: i32, %arg1: i32) -> (i32, i32, i32) {
    %c1_i32 = arith.constant 1 : i32
    %0 = arith.muli %arg1, %c1_i32 : i32
    %c1_i32_0 = arith.constant 1 : i32
    %1 = arith.subi %0, %c1_i32_0 : i32
    %c0_i32 = arith.constant 0 : i32
    %2 = arith.maxsi %1, %c0_i32 : i32
    %c0_i32_1 = arith.constant 0 : i32
    %c0_i32_2 = arith.constant 0 : i32
    return %arg0, %c0_i32_1, %2 : i32, i32, i32
  }
  func.func @transform_1(%arg0: i32, %arg1: i32) -> (i32, i32, i32) {
    %c0_i32 = arith.constant 0 : i32
    %c0_i32_0 = arith.constant 0 : i32
    return %arg0, %c0_i32, %arg1 : i32, i32, i32
  }
  func.func @transform_2(%arg0: i32, %arg1: i32) -> (i32, i32, i32) {
    %c1_i32 = arith.constant 1 : i32
    %0 = arith.addi %arg1, %c1_i32 : i32
    %c1_i32_0 = arith.constant 1 : i32
    %1 = arith.muli %0, %c1_i32_0 : i32
    %c2_i32 = arith.constant 2 : i32
    %2 = arith.minsi %1, %c2_i32 : i32
    %c0_i32 = arith.constant 0 : i32
    %c0_i32_1 = arith.constant 0 : i32
    return %arg0, %c0_i32, %2 : i32, i32, i32
  }
  func.func @transform_3(%arg0: i32, %arg1: i32) -> (i32, i32, i32) {
    %c0_i32 = arith.constant 0 : i32
    %c0_i32_0 = arith.constant 0 : i32
    %c0_i32_1 = arith.constant 0 : i32
    %c0_i32_2 = arith.constant 0 : i32
    return %c0_i32, %c0_i32_0, %c0_i32_1 : i32, i32, i32
  }
  func.func @transform_4(%arg0: i32, %arg1: i32) -> (i32, i32, i32) {
    %c0_i32 = arith.constant 0 : i32
    %c0_i32_0 = arith.constant 0 : i32
    %c0_i32_1 = arith.constant 0 : i32
    %c0_i32_2 = arith.constant 0 : i32
    return %c0_i32, %c0_i32_0, %c0_i32_1 : i32, i32, i32
  }
  func.func @transform_5(%arg0: i32, %arg1: i32) -> (i32, i32, i32) {
    %c0_i32 = arith.constant 0 : i32
    %c0_i32_0 = arith.constant 0 : i32
    %c0_i32_1 = arith.constant 0 : i32
    %c0_i32_2 = arith.constant 0 : i32
    return %c0_i32, %c0_i32_0, %c0_i32_1 : i32, i32, i32
  }
  func.func @transform_6(%arg0: i32, %arg1: i32) -> (i32, i32, i32) {
    %c0_i32 = arith.constant 0 : i32
    %c0_i32_0 = arith.constant 0 : i32
    %c0_i32_1 = arith.constant 0 : i32
    %c0_i32_2 = arith.constant 0 : i32
    return %c0_i32, %c0_i32_0, %c0_i32_1 : i32, i32, i32
  }
  func.func @transform_7(%arg0: i32, %arg1: i32) -> (i32, i32, i32) {
    %c0_i32 = arith.constant 0 : i32
    %c0_i32_0 = arith.constant 0 : i32
    return %arg0, %c0_i32, %arg1 : i32, i32, i32
  }
}

</mosaic_0001>

<bundles_post_ra>
// kernel: tpu_custom_call.1
= control target key start
LH: loop header
LB: loop body
LE: loop exit
PB: predicated region body
PF: predicated region fallthrough
CT: control target
= control target key end

     0   :  { %s5719_s0 = inlined_call_operand.vmem [shape: f32[2,32,320], index: 0, kind: input, shape index: {}]   ;;  %s5720_s1 = inlined_call_operand.hbm [shape: f32[2,32,320], index: 1, kind: input, shape index: {}]   ;;  %s5721_s2 = inlined_call_operand.hbm [shape: f32[2,32,320], index: 2, kind: input, shape index: {}]   ;;  %s5722_s3 = inlined_call_operand.hbm [shape: f32[3,32,96], index: 3, kind: input, shape index: {}]   ;;  %s5723_s4 = inlined_call_operand.vmem [shape: f32[3,32,1], index: 4, kind: input, shape index: {}]   ;;  %s5724_s5 = inlined_call_operand.hbm [shape: f32[3,32,96], index: 5, kind: input, shape index: {}]   ;;  %s5725_s6 = inlined_call_operand.vmem [shape: f32[3,32,1], index: 6, kind: input, shape index: {}]   ;;  %s5726_s7 = inlined_call_operand.hbm [shape: f32[2,32,320], index: 7, kind: output, shape index: {}]  }
   0x1   :  { %5754 = sst [smem:[#allocation33_spill]] %s5723_s4 }
   0x2   :  { %5755 = sst [smem:[#allocation34_spill]] %s5725_s6 }
   0x3   :  { %5756 = sst [smem:[#allocation35_spill]] %s5726_s7 }
   0x4   :  { %12 = vsyncpa [#allocation4], 0 }
   0x5   :  { %14 = vsyncpa [#allocation4 + $0x1], 0 }
   0x6   :  { %15 = vsyncpa [#allocation7], 0 }
   0x7   :  { %17 = vsyncpa [#allocation7 + $0x1], 0 }
   0x8   :  { %18 = vsyncpa [#allocation10], 0 }
   0x9   :  { %19 = vsyncpa [#allocation5], 0 }
   0xa   :  { %21 = vsyncpa [#allocation5 + $0x1], 0  ;;  %s4067_s24 = smov 0   ;;  %s4069_s25 = smov 0  }
   0xb   :  { %s4071_s26 = smov 0   ;;  %s4073_s27 = smov 0  }
   0xc   :  { %s4075_s28 = smov 0   ;;  %s4077_s29 = smov 0  }
   0xd   :  { %s4079_s30 = smov 0   ;;  %s4081_s8 = smov 0  }
   0xe   :  { %s4083_s9 = smov 0   ;;  %s4085_s10 = smov 0  }
   0xf   :  { %s4087_s11 = smov 0   ;;  %s4089_s12 = smov 0  }
  0x10   :  { %s4091_s13 = smov 0  }
  0x11 LB: > { %5757 = sst [smem:[#allocation17_spill]] %s3960_s25  ;;  %s4133_s14 = sadd.s32 4294967295, %s4004_s13   ;;  %s4004_s13 = sphi %s4091_s13, %s27_s13   ;;  %s4000_s12 = sphi %s4089_s12, %s5835_s12   ;;  %s3996_s11 = sphi %s4087_s11, %s5834_s11   ;;  %s3992_s10 = sphi %s4085_s10, %s5833_s10   ;;  %s3988_s9 = sphi %s4083_s9, %s5832_s9   ;;  %s3984_s8 = sphi %s4081_s8, %s5831_s8   ;;  %s3980_s30 = sphi %s4079_s30, %s5830_s30   ;;  %s3976_s29 = sphi %s4077_s29, %s5829_s29   ;;  %s3972_s28 = sphi %s4075_s28, %s5828_s28   ;;  %s3968_s27 = sphi %s4073_s27, %s5821_s27   ;;  %s3964_s26 = sphi %s4071_s26, %s5827_s26   ;;  %s3960_s25 = sphi %s4069_s25, %s5826_s25   ;;  %s3956_s24 = sphi %s4067_s24, %s5819_s24  }
  0x12   : > { %5758 = sst [smem:[#allocation18_spill]] %s3968_s27  ;;  %s4137_s16 = sadd.s32 1, %s3996_s11 }
  0x13   : > { %5759 = sst [smem:[#allocation19_spill]] %s3972_s28  ;;  %s39_s17 = sadd.s32 1, %s4000_s12 }
  0x14   : > { %5760 = sst [smem:[#allocation20_spill]] %s3980_s30  ;;  %p37_p0 = scmp.ge.s32.totalorder %s4137_s16, 3 }
  0x15   : > { %5761 = sst [smem:[#allocation21_spill]] %s3988_s9  ;;  %s2644_s18 = sadd.s32 4294967295, %s3996_s11 }
  0x16   : > { %5762 = sst [smem:[#allocation22_spill]] %s3992_s10  ;;  %p44_p1 = scmp.gt.s32.totalorder %s2644_s18, 0 }
  0x17   : > { %5763 = sst [smem:[#allocation23_spill]] %s4133_s14  ;;  %s54_s19 = sadd.s32 1, %s3984_s8 }
  0x18   : > { %s4144_s20 = scalar_select %p37_p0, 0, %s4137_s16  }
  0x19   : > { %s5837_s17 = smov (!%p37_p0, %s39_s17), %s4000_s12  ;;  %s5839_s18 = smov (!%p44_p1, %s2644_s18), 0 }
  0x1a   : > { %5764 = sst [smem:[#allocation24_spill]] %s4144_s20  ;;  %p41_p2 = scmp.ge.s32.totalorder %s5837_s17, 2 }
  0x1b   : > { %s2645_s21 = sadd.s32 4294967295, %s4144_s20  ;;  %p61_p4 = scmp.ne.s32.totalorder %s3984_s8, %s3980_s30 }
  0x1c   : > { %p47_p3 = scmp.gt.s32.totalorder %s2645_s21, 0  ;;  %s5841_s17 = smov (%p41_p2, %s5837_s17), 0 }
  0x1d   : > { %5765 = sst [smem:[#allocation25_spill]] %s5841_s17  ;;  %s49_s22 = ssub.s32 %s4000_s12, %s5841_s17 }
  0x1e   : > { %s5843_s21 = smov (!%p47_p3, %s2645_s21), 0  ;;  %p62_p5 = scmp.eq.s32.totalorder %s4004_s13, 0 }
  0x1f   : > { %s50_s23 = ssub.s32 %s5839_s18, %s5843_s21  ;;  %s78_s15 = ssub.s32 %s3996_s11, %s4144_s20 }
  0x20   : > { %s51_s7 = sor.u32 %s50_s23, %s49_s22  ;;  %p4162_p6 = por %p62_p5, %p61_p4 }
  0x21   : > { %p52_p7 = scmp.eq.s32.totalorder %s51_s7, 0  ;;  %s79_s17 = sor.u32 %s78_s15, %s49_s22 }
  0x22   : > { %s5766_s10 = scalar_select %p4162_p6, 1, 0 }
  0x23   : > { %p80_p8 = scmp.eq.s32.totalorder %s79_s17, 0  ;;  %s82_s6 = sadd.s32 1, %s3976_s29 }
  0x24   : > { %s4168_s21 = scalar_select %p52_p7, %s3984_s8, %s54_s19  }
  0x25   : > { %s4171_s4 = scalar_select %p80_p8, %s3976_s29, %s82_s6  }
  0x26   : > { %5767 = sst [smem:[#allocation26_spill]] %s4168_s21  ;;  %p89_p9 = scmp.ne.s32.totalorder %s3976_s29, %s3972_s28 }
  0x27   : > { %5768 = sst [smem:[#allocation27_spill]] %s4171_s4  ;;  %p5733_p10 = scmp.ne.s32.totalorder %s3972_s28, %s3968_s27 }
  0x28   : > { %p5735_p11 = scmp.eq.s32.totalorder %s4133_s14, 0  ;;  %p106_p12 = scmp.lt.s32.totalorder %s4137_s16, 2 }
  0x29   : > { %p4184_p13 = por %p89_p9, %p62_p5  ;;  %s108_s15 = sadd.s32 1, %s4144_s20 }
  0x2a   : > { %p4194_p0 = por %p5735_p11, %p5733_p10  ;;  %p109_p1 = scmp.lt.s32.totalorder %s108_s15, 2 }
  0x2b   : > { %s5769_s7 = scalar_select %p4184_p13, 1, 0 }
  0x2c   : > { %s5770_s6 = scalar_select %p4194_p0, 1, 0 }
  0x2d   : > { %s5845_s16 = smov (!%p106_p12, %s4137_s16), 2  ;;  %s5847_s15 = smov (!%p109_p1, %s108_s15), 2 }
  0x2e   : > { %5771 = sst [smem:[#allocation28_spill]] %s5770_s6  ;;  %s116_s17 = sadd.s32 1, %s3964_s26 }
  0x2f   : > { %p123_p2 = scmp.ne.s32.totalorder %s3964_s26, %s3960_s25  ;;  %s112_s19 = ssub.s32 %s5845_s16, %s5847_s15 }
  0x30   : > { %p129_p3 = scmp.ne.s32.totalorder %s3960_s25, %s3956_s24  ;;  %s113_s23 = sor.u32 %s112_s19, %s49_s22 }
  0x31   : > { %p4209_p4 = por %p123_p2, %p62_p5  ;;  %p114_p7 = scmp.eq.s32.totalorder %s113_s23, 0 }
  0x32   : > { %p4215_p8 = por %p129_p3, %p5735_p11  ;;  %p239_p12 = scmp.eq.s32.totalorder %s4133_s14, 5 }
  0x33   : > { %s5772_s20 = scalar_select %p4209_p4, 1, 0 }
  0x34   : > { %s5773_s21 = scalar_select %p4215_p8, 1, 0 }
  0x35   : > { %s5775_s4 = sadd.s32 4294967294, %s4004_s13   ;;  %p4228_p10 = por %p239_p12, %p89_p9 }
  0x36   : > { %5774 = sst [smem:[#allocation29_spill]] %s5773_s21  ;;  %p245_p1 = scmp.eq.s32.totalorder %s5775_s4, 5 }
  0x37   : > { %s4223_s9 = scalar_select %p114_p7, %s3964_s26, %s116_s17  }
  0x38   : > { %s5777_s24 = scalar_select %p4228_p10, 1, 0 }
  0x39   : > { %5776 = sst [smem:[#allocation30_spill]] %s4223_s9  ;;  %p5779_p5 = scmp.ne.s32.totalorder %s3972_s28, %s3968_s27 }
  0x3a   : > { %5778 = sst [smem:[#allocation31_spill]] %s5777_s24  ;;  %p2646_p0 = scmp.ge.s32.totalorder %s4004_s13, 1 }
  0x3b   : > { %p4235_p2 = por %p245_p1, %p5779_p5  ;;  %p252_p3 = scmp.lt.s32.totalorder %s4004_s13, 7 }
  0x3c   : > { %s4006_s4 = smov [#allocation8]   ;;  %p5783_p7 = scmp.eq.s32.totalorder %s4133_s14, 0 }
  0x3d   : > { %s5780_s22 = scalar_select %p4235_p2, 1, 0 }
  0x3e   : > { %p4241_p11 = pnand %p2646_p0, %p252_p3  ;;  %s264_s17 = sshll.u32 %s4006_s4, 4  ;;  %s265_s17 = int_to_ptr.vmem [resolvable:$true] %s264_s17 }
  0x3f   : > { %5781 = sst [smem:[#allocation32_spill]] %s5780_s22  ;;  %s4007_s23 = smov [#allocation9]  }
  0x40   : > { %s5782_s15 = scalar_select %p4241_p11, 1, 0 }
  0x41   : > { %p3242_p9 = pneg %p4241_p11  ;;  %s280_s9 = sshll.u32 %s4007_s23, 4  ;;  %s4253_s9 = int_to_ptr.vmem [resolvable:$true] %s280_s9 }
  0x42   : > { %s3742_s24 = scalar_lea.hbm %s5722_s3, 1536 }
  0x43   : > { %p4249_p12 = pnand %p3242_p9, %p5783_p7  ;;  %p3743_p0 = scmp.ne.s32.totalorder %s5722_s3, %s3742_s24 }
  0x44   : > { %p3749_p9 = scmp.lt.u32.totalorder %s3742_s24, %s5722_s3 }
  0x45   : > { %p3744_p1 = pneg %p4249_p12 }
  0x47   : > { %p3745_p5 = pnand %p3744_p1, %p3743_p0 }
  0x49   : > { %p3746_p3 = pneg %p3745_p5 }
  0x4b   : > { %p3751_p7 = pnand %p3749_p9, %p3746_p3 }
  0x4d   : > { %3754 = shalt.err (!%p3751_p7)
}
  0x4e   : > { %s3755_s23 = scalar_lea.vmem %s265_s17, 1536  ;;  %p3763_p11 = scmp.lt.s32.totalorder %s265_s17, %s265_s17 }
  0x4f   : > { %p3756_p2 = scmp.ne.s32.totalorder %s265_s17, %s3755_s23  ;;  %p3764_p4 = scmp.lt.s32.totalorder %s3755_s23, %s3755_s23 }
  0x51   : > { %p3758_p10 = pnand %p3756_p2, %p3744_p1  ;;  %p3765_p13 = por %p3764_p4, %p3763_p11 }
  0x53   : > { %p3759_p8 = pneg %p3758_p10 }
  0x55   : > { %p3766_p6 = pnand %p3765_p13, %p3759_p8 }
  0x57   : > { %3769 = shalt.err (!%p3766_p6)
}
  0x58   : > { %s4008_s27 = smov 128   ;;  %s4009_s21 = smov 8  }
  0x59   : > { %3245 = dma.hbm_to_vmem [thread:$0]  (!%p4249_p12), %s5722_s3, 1536, %s265_s17, [#allocation7], %s4008_s27, %s4008_s27, %s4009_s21  }
  0x5a   : > { %s3770_s4 = scalar_lea.hbm %s5724_s5, 1536 }
  0x5b   : > { %p3771_p10 = scmp.ne.s32.totalorder %s5724_s5, %s3770_s4  ;;  %p3777_p13 = scmp.lt.u32.totalorder %s3770_s4, %s5724_s5 }
  0x5d   : > { %p3773_p6 = pnand %p3771_p10, %p3744_p1 }
  0x5f   : > { %p3774_p11 = pneg %p3773_p6 }
  0x61   : > { %p3779_p4 = pnand %p3777_p13, %p3774_p11 }
  0x63   : > { %3782 = shalt.err (!%p3779_p4)
}
  0x64   : > { %s3783_s17 = scalar_lea.vmem %s4253_s9, 1536  ;;  %p3791_p5 = scmp.lt.s32.totalorder %s4253_s9, %s4253_s9 }
  0x65   : > { %p3784_p8 = scmp.ne.s32.totalorder %s4253_s9, %s3783_s17  ;;  %p3792_p3 = scmp.lt.s32.totalorder %s3783_s17, %s3783_s17 }
  0x67   : > { %p3786_p2 = pnand %p3784_p8, %p3744_p1  ;;  %p3793_p9 = por %p3792_p3, %p3791_p5 }
  0x69   : > { %p3787_p0 = pneg %p3786_p2 }
  0x6b   : > { %p3794_p7 = pnand %p3793_p9, %p3787_p0 }
  0x6d   : > { %3797 = shalt.err (!%p3794_p7)
}
  0x6e   : > { %3248 = dma.hbm_to_vmem [thread:$0]  (!%p4249_p12), %s5724_s5, 1536, %s4253_s9, [#allocation10], %s4008_s27, %s4008_s27, %s4009_s21  }
  0x6f   : > { %p2649_p10 = scmp.ge.s32.totalorder %s4004_s13, 6 }
  0x70   : > { %p5785_p6 = scmp.ne.s32.totalorder (!%p2649_p10), %s5766_s10, 0 }
  0x71   : > { %293 = sbr.rel (%p2649_p10) target bundleno = 184 (0xb8), region = 32 }
  0x78   : > { %296 = sbr.rel (!%p5785_p6) target bundleno = 129 (0x81), region = 36  ;;  %s298_s6 = sand.u32 (%p5785_p6), 1, %s3984_s8  }
  0x79   : > { %s3224_s25 = smul.u32 (%p5785_p6), 12, %s4000_s12  ;;  %s2650_s14 = sshll.u32 (%p5785_p6), %s298_s6, 5 }
  0x7a   : > { %s300_s9 = scalar_lea.vmem (%p5785_p6), [#allocation2], %s2650_s14 }
  0x7b   : > { %s305_s24 = sadd.s32 (%p5785_p6), %s3224_s25, %s5839_s18 }
  0x7c   : > { %s2652_s22 = sshll.u32 (%p5785_p6), %s305_s24, 3 }
  0x7d   : > { %s307_s23 = scalar_lea.vmem (%p5785_p6), %s5719_s0, %s2652_s22 }
  0x7e   : > { %v341_v0 = vld [vmem:[%s307_s23] sm:$0xff] (%p5785_p6)  ;;  %v343_v1 = vld [vmem:[%s307_s23 + $0x18] sm:$0xff] (%p5785_p6)  ;;  %v345_v2 = vld [vmem:[%s307_s23 + $0x30] sm:$0xff] (%p5785_p6) }
  0x7f   : > { %342 = vst [vmem:[%s300_s9] sm:$0xff] %v341_v0  ;;  %344 = vst [vmem:[%s300_s9 + $0x8] sm:$0xff] %v343_v1  ;;  %v347_v3 = vld [vmem:[%s307_s23 + $0x48] sm:$0xff] }
  0x80   : > { %346 = vst [vmem:[%s300_s9 + $0x10] sm:$0xff] %v345_v2  ;;  %348 = vst [vmem:[%s300_s9 + $0x18] sm:$0xff] %v347_v3 }
  0x81 PF: > { %s355_s10 = sand.u32 1, %s3976_s29   ;;  %s3225_s18 = smul.u32 12, %s4000_s12 }
  0x82   : > { %s2653_s27 = sshll.u32 %s355_s10, 5  ;;  %s377_s24 = sand.u32 1, %s4004_s13  }
  0x83   : > { %s364_s21 = sadd.s32 %s3996_s11, %s3225_s18  ;;  %s359_s28 = scalar_lea.vmem [#allocation3], %s2653_s27 }
  0x84   : > { %s2654_s17 = sshll.u32 %s364_s21, 7  ;;  %s367_s30 = sshll.u32 %s359_s28, 4  ;;  %s4321_s30 = int_to_ptr.vmem [resolvable:$true] %s367_s30 }
  0x85   : > { %s4319_s14 = scalar_lea.hbm %s5720_s1, %s2654_s17  ;;  %s4324_s22 = scalar_lea.sflag [#allocation4], %s355_s10 }
  0x86   : > { %s3798_s19 = scalar_lea.hbm %s4319_s14, 512  ;;  %p5786_p1 = scmp.ne.s32.totalorder %s5769_s7, 0 }
  0x87   : > { %p3799_p12 = scmp.ne.s32.totalorder %s4319_s14, %s3798_s19  ;;  %s3802_s9 = scalar_lea.hbm %s5720_s1, 3072 }
  0x88   : > { %p3803_p4 = scmp.lt.u32.totalorder %s4319_s14, %s5720_s1  ;;  %p3804_p8 = scmp.lt.u32.totalorder %s3802_s9, %s3798_s19 }
  0x89   : > { %p3800_p11 = pnand %p3799_p12, %p5786_p1  ;;  %p3806_p0 = scmp.lt.u32.totalorder %s3798_s19, %s4319_s14 }
  0x8a   : > { %p3805_p2 = por %p3804_p8, %p3803_p4 }
  0x8b   : > { %p3801_p13 = pneg %p3800_p11 }
  0x8c   : > { %p3807_p5 = por %p3806_p0, %p3805_p2 }
  0x8e   : > { %p3808_p3 = pnand %p3807_p5, %p3801_p13 }
  0x90   : > { %3811 = shalt.err (!%p3808_p3)
}
  0x91   : > { %s3812_s10 = scalar_lea.vmem %s4321_s30, 512  ;;  %s4010_s17 = smov [#allocation3]  }
  0x92   : > { %p3813_p9 = scmp.ne.s32.totalorder %s4321_s30, %s3812_s10  ;;  %s3816_s28 = sshll.u32 %s4010_s17, 4  ;;  %s3817_s28 = int_to_ptr.vmem [resolvable:$false] %s3816_s28 }
  0x93   : > { %s3818_s6 = scalar_lea.vmem %s3817_s28, 1024  ;;  %p3819_p6 = scmp.lt.s32.totalorder %s4321_s30, %s3817_s28 }
  0x94   : > { %p3814_p7 = pnand %p3813_p9, %p5786_p1  ;;  %p3820_p12 = scmp.lt.s32.totalorder %s3818_s6, %s3812_s10 }
  0x96   : > { %p3815_p10 = pneg %p3814_p7  ;;  %p3821_p11 = por %p3820_p12, %p3819_p6 }
  0x98   : > { %p3822_p4 = pnand %p3821_p11, %p3815_p10 }
  0x9a   : > { %3825 = shalt.err (!%p3822_p4)
}
  0x9b   : > { %s4011_s25 = smov 384   ;;  %s4012_s19 = smov 128  }
  0x9c   : > { %s4013_s4 = smov 8   ;;  %s379_s23 = sand.u32 1, %s3964_s26  }
  0x9d   : > { %3232 = dma.hbm_to_vmem [thread:$0]  (%p5786_p1), %s4319_s14, 512, %s4321_s30, %s4324_s22, %s4011_s25, %s4012_s19, %s4013_s4  }
  0x9e   : > { %s2655_s9 = sshll.u32 %s379_s23, 5  ;;  %s389_s27 = sadd.s32 %s3225_s18, %s5845_s16 }
  0x9f   : > { %s2656_s21 = sshll.u32 %s389_s27, 7  ;;  %s381_s6 = scalar_lea.vmem [#allocation6], %s2655_s9 }
  0xa0   : > { %s4358_s28 = scalar_lea.hbm %s5721_s2, %s2656_s21  ;;  %s392_s7 = sshll.u32 %s381_s6, 4  ;;  %s4360_s7 = int_to_ptr.vmem [resolvable:$true] %s392_s7 }
  0xa1   : > { %s4364_s30 = scalar_lea.sflag [#allocation7], %s377_s24  ;;  %s3826_s14 = scalar_lea.hbm %s4358_s28, 512 }
  0xa2   : > { %p3827_p1 = scmp.ne.s32.totalorder %s4358_s28, %s3826_s14  ;;  %p5787_p13 = scmp.ne.s32.totalorder %s5772_s20, 0 }
  0xa3   : > { %s3830_s22 = scalar_lea.hbm %s5721_s2, 3072  ;;  %p3831_p0 = scmp.lt.u32.totalorder %s4358_s28, %s5721_s2 }
  0xa4   : > { %p3828_p8 = pnand %p3827_p1, %p5787_p13  ;;  %p3832_p5 = scmp.lt.u32.totalorder %s3830_s22, %s3826_s14 }
  0xa5   : > { %p3834_p9 = scmp.lt.u32.totalorder %s3826_s14, %s4358_s28 }
  0xa6   : > { %p3829_p2 = pneg %p3828_p8  ;;  %p3833_p3 = por %p3832_p5, %p3831_p0 }
  0xa8   : > { %p3835_p7 = por %p3834_p9, %p3833_p3 }
  0xaa   : > { %p3836_p10 = pnand %p3835_p7, %p3829_p2 }
  0xac   : > { %3839 = shalt.err (!%p3836_p10)
}
  0xad   : > { %s3840_s24 = scalar_lea.vmem %s4360_s7, 512  ;;  %s4014_s9 = smov [#allocation6]  }
  0xae   : > { %p3841_p6 = scmp.ne.s32.totalorder %s4360_s7, %s3840_s24  ;;  %s3844_s21 = sshll.u32 %s4014_s9, 4  ;;  %s3845_s21 = int_to_ptr.vmem [resolvable:$false] %s3844_s21 }
  0xaf   : > { %s3846_s10 = scalar_lea.vmem %s3845_s21, 1024  ;;  %p3847_p4 = scmp.lt.s32.totalorder %s4360_s7, %s3845_s21 }
  0xb0   : > { %p3842_p12 = pnand %p3841_p6, %p5787_p13  ;;  %p3848_p1 = scmp.lt.s32.totalorder %s3846_s10, %s3840_s24 }
  0xb2   : > { %p3843_p11 = pneg %p3842_p12  ;;  %p3849_p8 = por %p3848_p1, %p3847_p4 }
  0xb4   : > { %p3850_p0 = pnand %p3849_p8, %p3843_p11 }
  0xb6   : > { %3853 = shalt.err (!%p3850_p0)
}
  0xb7   : > { %3233 = dma.hbm_to_vmem [thread:$0]  (%p5787_p13), %s4358_s28, 512, %s4360_s7, %s4364_s30, %s4011_s25, %s4012_s19, %s4013_s4  }
  0xb8 PF: > { %p5788_p2 = scmp.ne.s32.totalorder %s5782_s15, 0 }
  0xb9   : > { %s5789_s17 = sld [smem:[#allocation20_spill]] (!%p5788_p2)  ;;  %s5790_s6 = sld [smem:[#allocation19_spill]] (!%p5788_p2) }
  0xba   : > { %404 = sbr.rel (%p5788_p2) target bundleno = 2529 (0x9e1), region = 82  ;;  %s5791_s14 = sld [smem:[#allocation28_spill]] (!%p5788_p2) }
  0xbf   : > { %s407_s16 = sand.u32 (!%p5788_p2), 1, %s5789_s17   ;;  %s4395_s18 = sand.u32 (!%p5788_p2), 1, %s5790_s6  }
  0xc0   : > { %s2658_s20 = sshll.u32 (!%p5788_p2), %s407_s16, 5  ;;  %s2659_s22 = sshll.u32 (!%p5788_p2), %s4395_s18, 5 }
  0xc1   : > { %s4398_s23 = scalar_lea.vmem [#allocation2], %s2658_s20  ;;  %s414_s27 = scalar_lea.sflag [#allocation4], %s4395_s18 }
  0xc2   : > { %s4403_s25 = scalar_lea.vmem [#allocation3], %s2659_s22  ;;  %p5792_p13 = scmp.ne.s32.totalorder %s5791_s14, 0 }
  0xc4   : > { %3935 = dma.done.wait (%p5792_p13), %s414_s27, 512  }
  0xc5   : > { %3937 = vsyncadd (%p5792_p13), %s414_s27, 4294966784  ;;  %s5793_s15 = sld [smem:[#allocation23_spill]]  ;;  %s5794_s19 = sld [smem:[#allocation17_spill]] }
  0xc6   : > { %s5795_s4 = sld [smem:[#allocation29_spill]] }
  0xcb   : > { %s422_s28 = sand.u32 1, %s5793_s15   ;;  %s424_s7 = sand.u32 1, %s5794_s19  }
  0xcc   : > { %s2660_s30 = sshll.u32 %s424_s7, 5  ;;  %s423_s24 = scalar_lea.sflag [#allocation7], %s422_s28 }
  0xcd   : > { %s4411_s9 = scalar_lea.vmem [#allocation6], %s2660_s30  ;;  %p5796_p5 = scmp.ne.s32.totalorder %s5795_s4, 0 }
  0xcf   : > { %3939 = dma.done.wait (%p5796_p5), %s423_s24, 512  }
  0xd0   : > { %3941 = vsyncadd (%p5796_p5), %s423_s24, 4294966784  ;;  %p5797_p3 = scmp.eq.s32.totalorder %s5793_s15, 0 }
  0xd2   : > { %3943 = dma.done.wait (%p5797_p3), [#allocation7], 1536   ;;  %p5798_p9 = pmov %p5797_p3 }
  0xd3   : > { %p5799_p7 = pmov %p5797_p3 }
  0xd4   : > { %3945 = vsyncadd (%p5798_p9), [#allocation7], 4294965760 }
  0xd5   : > { %3947 = dma.done.wait (%p5799_p7), [#allocation10], 1536   ;;  %p5800_p10 = pmov %p5797_p3 }
  0xd6   : > { %s5801_s21 = sld [smem:[#allocation21_spill]]  ;;  %v482_v4 = vlaneseq  ;;  %v501_v12 = vld [vmem:[%s4398_s23 + $0x10] sm:$0xff]  ;;  %v502_v13 = vld [vmem:[%s4398_s23 + $0x18] sm:$0xff]  ;;  %v499_v17 = vld [vmem:[%s4398_s23] sm:$0xff]  ;;  %s4015_s6 = smov 1  }
  0xd7   : > { %3949 = vsyncadd (%p5800_p10), [#allocation10], 4294965760  ;;  %v500_v18 = vld [vmem:[%s4398_s23 + $0x8] sm:$0xff]  ;;  %v507_v24 = vld [vmem:[%s4411_s9] sm:$0xff]  ;;  %s4016_s14 = smov 127   ;;  %s5808_s23 = sld [smem:[#allocation33_spill]] }
  0xd8   : > { %v4426_v5 = vand.u32 127, %v482_v4  ;;  %v508_v25 = vld [vmem:[%s4411_s9 + $0x8] sm:$0xff]  ;;  %v503_v29 = vld [vmem:[%s4403_s25] sm:$0xff]  ;;  %v509_v41 = vld [vmem:[%s4411_s9 + $0x10] sm:$0xff]  ;;  %s5809_s24 = sld [smem:[#allocation34_spill]]  ;;  %s4019_s15 = smov 3  }
  0xd9   : > { %v504_v34 = vld [vmem:[%s4403_s25 + $0x8] sm:$0xff]  ;;  %v510_v42 = vld [vmem:[%s4411_s9 + $0x18] sm:$0xff]  ;;  %v505_v43 = vld [vmem:[%s4403_s25 + $0x10] sm:$0xff]  ;;  %s4020_s19 = smov 125   ;;  %s4021_s30 = smov 5  }
  0xda   : > { %v484_v7 = vadd.s32 128, %v4426_v5  ;;  %v485_v9 = vadd.s32 256, %v4426_v5  ;;  %v506_v50 = vld [vmem:[%s4403_s25 + $0x18] sm:$0xff]  ;;  %s473_s16 = scalar_lea.vmem [#allocation11], %s2659_s22  ;;  %s5813_s4 = sld [smem:[#allocation35_spill]] }
  0xdb   : > { %s2490_s25 = sshll.u32 %s473_s16, 4  ;;  %s2476_s7 = scalar_lea.sflag [#allocation5], %s4395_s18  ;;  %s5636_s25 = int_to_ptr.vmem [resolvable:$true] %s2490_s25 }
  0xdc   : > { %s2664_s10 = sshll.u32 %s5801_s21, 7 }
  0xdd   : > { %s2665_s17 = sadd.s32 4294967168, %s2664_s10 }
  0xde   : > { %v486_v6 = vstv %s2665_s17  ;;  %s5810_s17 = smov %s5809_s24 }
  0xdf   : > { %v487_v8 = vadd.s32 %v486_v6, %v4426_v5  ;;  %v488_v10 = vadd.s32 %v486_v6, %v484_v7  ;;  %v489_v14 = vadd.s32 %v486_v6, %v485_v9 }
  0xe1   : > { %vm490_vm0 = vcmp.ge.s32.totalorder %v487_v8, 0  ;;  %vm493_vm1 = vcmp.lt.s32.totalorder %v487_v8, 320  ;;  %vm491_vm3 = vcmp.ge.s32.totalorder %v488_v10, 0  ;;  %vm494_vm4 = vcmp.lt.s32.totalorder %v488_v10, 320 }
  0xe2   : > { %vm4431_vm2 = vmand %vm490_vm0, %vm493_vm1  ;;  %vm492_vm8 = vcmp.ge.s32.totalorder %v489_v14, 0  ;;  %vm495_vm9 = vcmp.lt.s32.totalorder %v489_v14, 320  ;;  %v4017_v10 = vmov 0.0   ;;  %v643_v14 = vld [vmem:[%s5808_s23] sm:$0xff] }
  0xe3   : > { %v4439_v15 = vsel %vm4431_vm2, %v501_v12, 0.0  ;;  %v4443_v16 = vsel %vm4431_vm2, %v502_v13, 0.0  ;;  %vm4451_vm7 = vmand %vm491_vm3, %vm494_vm4  ;;  %v4457_v22 = vsel %vm4431_vm2, %v499_v17, 0.0  ;;  %v4461_v23 = vsel %vm4431_vm2, %v500_v18, 0.0  ;;  %744 = vmatprep.mubr.f32.mxu1 %v4017_v10  ;;  %1078 = vmatprep.mubr.f32.mxu0 %v4017_v10  ;;  %v644_v17 = vld [vmem:[%s5808_s23 + $0x8] sm:$0xff] }
  0xe4   : > { %vm535_vm5 = vcmp.ge.f32.partialorder %v4439_v15, 0.0  ;;  %vm538_vm6 = vcmp.ge.f32.partialorder %v4443_v16, 0.0  ;;  %v547_v19 = vmul.f32 0.1, %v4439_v15  ;;  %v550_v20 = vmul.f32 0.1, %v4443_v16  ;;  %vm4473_vm12 = vmand %vm492_vm8, %vm495_vm9 }
  0xe5   : > { %vm529_vm10 = vcmp.ge.f32.partialorder %v4457_v22, 0.0  ;;  %vm532_vm11 = vcmp.ge.f32.partialorder %v4461_v23, 0.0  ;;  %v541_v31 = vmul.f32 0.1, %v4457_v22  ;;  %v544_v32 = vmul.f32 0.1, %v4461_v23 }
  0xe6   : > { %v4466_v26 = vsel %vm535_vm5, %v4439_v15, %v547_v19  ;;  %v4469_v27 = vsel %vm538_vm6, %v4443_v16, %v550_v20  ;;  %v4484_v33 = vsel %vm4473_vm12, %v507_v24, 0.0  ;;  %v4489_v35 = vsel %vm4473_vm12, %v508_v25, 0.0  ;;  %v645_v19 = vld [vmem:[%s5808_s23 + $0x10] sm:$0xff]  ;;  %v646_v20 = vld [vmem:[%s5808_s23 + $0x18] sm:$0xff] }
  0xe7   : > { %v3385_v30 = vpack.i.bf16 %v4469_v27, %v4466_v26  ;;  %vm531_vm13 = vcmp.ge.f32.partialorder %v4484_v33, 0.0  ;;  %v543_v36 = vmul.f32 0.1, %v4484_v33  ;;  %v4495_v37 = vsel %vm4451_vm7, %v503_v29, 0.0 }
  0xe8   : > { %v4499_v38 = vsel %vm529_vm10, %v4457_v22, %v541_v31  ;;  %v4502_v39 = vsel %vm532_vm11, %v4461_v23, %v544_v32  ;;  %vm534_vm14 = vcmp.ge.f32.partialorder %v4489_v35, 0.0  ;;  %v546_v40 = vmul.f32 0.1, %v4489_v35 }
  0xe9   : > { %3386 = vrot.lane.b32.xlu1 %v3385_v30, %s4015_s6  ;;  %v3380_v44 = vpack.i.bf16 %v4502_v39, %v4499_v38  ;;  %v555_v45 = vsel %vm531_vm13, %v4484_v33, %v543_v36  ;;  %v4514_v46 = vsel %vm4451_vm7, %v504_v34, 0.0  ;;  %vm530_vm15 = vcmp.ge.f32.partialorder %v4495_v37, 0.0 }
  0xea   : > { %v558_v47 = vsel %vm534_vm14, %v4489_v35, %v546_v40  ;;  %vm533_vm0 = vcmp.ge.f32.partialorder %v4514_v46, 0.0  ;;  %v542_v48 = vmul.f32 0.1, %v4495_v37  ;;  %v545_v49 = vmul.f32 0.1, %v4514_v46 }
  0xeb   : > { %3381 = vrot.lane.b32.xlu0 %v3380_v44, %s4015_s6  ;;  %v3395_v51 = vpack.i.bf16 %v558_v47, %v555_v45  ;;  %v4525_v52 = vsel %vm4473_vm12, %v509_v41, 0.0  ;;  %v4529_v53 = vsel %vm4473_vm12, %v510_v42, 0.0  ;;  %v4533_v54 = vsel %vm4451_vm7, %v505_v43, 0.0 }
  0xec   : > { %v4536_v55 = vsel %vm530_vm15, %v4495_v37, %v542_v48  ;;  %v4539_v56 = vsel %vm533_vm0, %v4514_v46, %v545_v49  ;;  %vm537_vm1 = vcmp.ge.f32.partialorder %v4525_v52, 0.0  ;;  %vm540_vm3 = vcmp.ge.f32.partialorder %v4529_v53, 0.0 }
  0xed   : > { %3396 = vrot.lane.b32.xlu1 %v3395_v51, %s4015_s6  ;;  %v3390_v57 = vpack.i.bf16 %v4539_v56, %v4536_v55  ;;  %v549_v58 = vmul.f32 0.1, %v4525_v52  ;;  %v552_v59 = vmul.f32 0.1, %v4529_v53  ;;  %v4550_v60 = vsel %vm4451_vm7, %v506_v50, 0.0 }
  0xee   : > { %vm536_vm4 = vcmp.ge.f32.partialorder %v4533_v54, 0.0  ;;  %vm539_vm5 = vcmp.ge.f32.partialorder %v4550_v60, 0.0  ;;  %v548_v61 = vmul.f32 0.1, %v4533_v54  ;;  %v551_v62 = vmul.f32 0.1, %v4550_v60 }
  0xef   : > { %3391 = vrot.lane.b32.xlu0 %v3390_v57, %s4015_s6  ;;  %v561_v63 = vsel %vm537_vm1, %v4525_v52, %v549_v58  ;;  %v564_v0 = vsel %vm540_vm3, %v4529_v53, %v552_v59  ;;  %v2968_v6 = vpack.c.bf16 %v4539_v56, %v4536_v55  ;;  %v2970_v7 = vpack.c.bf16 %v4502_v39, %v4499_v38 }
  0xf0   : > { %v3405_v1 = vpack.i.bf16 %v564_v0, %v561_v63  ;;  %v4560_v2 = vsel %vm536_vm4, %v4533_v54, %v548_v61  ;;  %v4563_v3 = vsel %vm539_vm5, %v4550_v60, %v551_v62  ;;  %v2974_v9 = vpack.c.bf16 %v4469_v27, %v4466_v26 }
  0xf1   : > { %v3400_v4 = vpack.i.bf16 %v4563_v3, %v4560_v2  ;;  %v2972_v8 = vpack.c.bf16 %v4563_v3, %v4560_v2  ;;  %v4585_v12 = vpack.c.bf16 %v558_v47, %v555_v45  ;;  %v4587_v13 = vpack.c.bf16 %v564_v0, %v561_v63 }
  0xf2   : > { %3406 = vrot.lane.b32.xlu1 %v3405_v1, %s4015_s6  ;;  %v4018_v18 = vmov 0   ;;  %vm589_vm6 = vcmp.lt.s32.totalorder %v4426_v5, 1  ;;  %vm626_vm8 = vcmp.lt.s32.totalorder %v4426_v5, 127  ;;  %vm667_vm9 = vcmask 785408  }
  0xf3   : > { %3401 = vrot.lane.b32.xlu0 %v3400_v4, %s4015_s6  ;;  %3441 = vset.pattern.permute.xlu1 %v4018_v18 }
  0xf4   : > { %3440 = vset.pattern.permute.xlu0 %v4018_v18 }
  0xf6   : > { %3421 = vrot.lane.b32.xlu1 %v3395_v51, %s4016_s14 }
  0xf7   : > { %3411 = vrot.lane.b32.xlu0 %v3390_v57, %s4016_s14 }
  0xfa   : > { %3426 = vrot.lane.b32.xlu1 %v3400_v4, %s4016_s14 }
  0xfb   : > { %3416 = vrot.lane.b32.xlu0 %v3380_v44, %s4016_s14 }
  0xfe   : > { %3436 = vrot.lane.b32.xlu1 %v3385_v30, %s4016_s14 }
  0xff   : > { %3431 = vrot.lane.b32.xlu0 %v3405_v1, %s4016_s14 }
 0x102   : > { %654 = vperm.xlu1 %3441, %v644_v17  }
 0x103   : > { %649 = vperm.xlu0 %3440, %v643_v14  }
 0x106   : > { %659 = vperm.xlu1 %3441, %v645_v19  }
 0x107   : > { %664 = vperm.xlu0 %3440, %v646_v20  }
 0x15b   : > { %v3387_v24 = vpop.permute.xlu1 %3386 }
 0x15c   : > { %v3389_v44 = vunpack.i.h.bf16 %v3387_v24  ;;  %v3388_v50 = vunpack.i.l.bf16 %v3387_v24 }
 0x15d   : > { %v3382_v25 = vpop.permute.xlu0 %3381 }
 0x15e   : > { %v3384_v30 = vunpack.i.h.bf16 %v3382_v25  ;;  %v3383_v31 = vunpack.i.l.bf16 %v3382_v25 }
 0x15f   : > { %v4602_v29 = vpop.permute.xlu1 %3396 }
 0x160   : > { %v3399_v32 = vunpack.i.h.bf16 %v4602_v29  ;;  %v3398_v34 = vunpack.i.l.bf16 %v4602_v29 }
 0x161   : > { %v4606_v36 = vpop.permute.xlu0 %3391 }
 0x162   : > { %v3394_v40 = vunpack.i.h.bf16 %v4606_v36  ;;  %v3393_v41 = vunpack.i.l.bf16 %v4606_v36  ;;  %v598_v42 = vsel %vm589_vm6, %v3398_v34, %v3383_v31  ;;  %v599_v43 = vsel %vm589_vm6, %v3399_v32, %v3384_v30  ;;  %v642_v36 = vld [vmem:[#allocation8 + $0x18] sm:$0xff] }
 0x163   : > { %v2962_v49 = vpack.c.bf16 %v599_v43, %v598_v42 }
 0x164   : > { %v4618_v45 = vpop.permute.xlu1 %3406  ;;  %v594_v47 = vsel %vm589_vm6, %v3383_v31, %v3393_v41  ;;  %v595_v48 = vsel %vm589_vm6, %v3384_v30, %v3394_v40  ;;  %v590_v26 = vsel %vm589_vm6, %v3393_v41, %v3398_v34  ;;  %v591_v27 = vsel %vm589_vm6, %v3394_v40, %v3399_v32  ;;  %v640_v32 = vld [vmem:[#allocation8 + $0x8] sm:$0xff]  ;;  %v641_v34 = vld [vmem:[#allocation8 + $0x10] sm:$0xff] }
 0x165   : > { %v3409_v51 = vunpack.i.h.bf16 %v4618_v45  ;;  %v3408_v57 = vunpack.i.l.bf16 %v4618_v45  ;;  %v3402_v58 = vpop.permute.xlu0 %3401  ;;  %v2960_v59 = vpack.c.bf16 %v595_v48, %v594_v47 }
 0x166   : > { %v3404_v61 = vunpack.i.h.bf16 %v3402_v58  ;;  %v3403_v62 = vunpack.i.l.bf16 %v3402_v58 }
 0x167   : > { %2961 = vmatprep.subr.bf16.mxu1 %v2960_v59  ;;  %v600_v63 = vsel %vm589_vm6, %v3408_v57, %v3388_v50  ;;  %v601_v0 = vsel %vm589_vm6, %v3409_v51, %v3389_v44 }
 0x168   : > { %2963 = vmatpush1.bf16.msra.mxu1 %v2962_v49  ;;  %v4632_v1 = vpop.permute.xlu1 %3421  ;;  %v596_v4 = vsel %vm589_vm6, %v3388_v50, %v3403_v62  ;;  %v597_v14 = vsel %vm589_vm6, %v3389_v44, %v3404_v61  ;;  %v2966_v17 = vpack.c.bf16 %v601_v0, %v600_v63 }
 0x169   : > { %v3412_v18 = vpop.permute.xlu0 %3411  ;;  %v2964_v19 = vpack.c.bf16 %v597_v14, %v596_v4  ;;  %v3424_v25 = vunpack.i.h.bf16 %v4632_v1  ;;  %v3423_v30 = vunpack.i.l.bf16 %v4632_v1  ;;  %v2984_v4 = vpack.c.bf16 %v591_v27, %v590_v26  ;;  %v639_v14 = vld [vmem:[#allocation8] sm:$0xff] }
 0x16a   : > { %v3414_v20 = vunpack.i.h.bf16 %v3412_v18  ;;  %v3413_v24 = vunpack.i.l.bf16 %v3412_v18  ;;  %v593_v18 = vsel %vm589_vm6, %v3404_v61, %v3409_v51 }
 0x16b   : > { %2965 = vmatprep.subr.bf16.mxu1 %v2964_v19 }
 0x16c   : > { %2967 = vmatpush1.bf16.msra.mxu1 %v2966_v17  ;;  %v3427_v31 = vpop.permute.xlu1 %3426  ;;  %v627_v45 = vsel %vm626_vm8, %v3413_v24, %v3423_v30  ;;  %v628_v47 = vsel %vm626_vm8, %v3414_v20, %v3424_v25  ;;  %v592_v17 = vsel %vm589_vm6, %v3403_v62, %v3408_v57 }
 0x16d   : > { %v3417_v42 = vpop.permute.xlu0 %3416  ;;  %2969 = vmatprep.subr.bf16.mxu1 %v2968_v6  ;;  %v3429_v48 = vunpack.i.h.bf16 %v3427_v31  ;;  %v3428_v49 = vunpack.i.l.bf16 %v3427_v31  ;;  %v2976_v6 = vpack.c.bf16 %v628_v47, %v627_v45  ;;  %v2988_v29 = vpack.c.bf16 %v593_v18, %v592_v17 }
 0x16e   : > { %v3419_v43 = vunpack.i.h.bf16 %v3417_v42  ;;  %v3418_v44 = vunpack.i.l.bf16 %v3417_v42 }
 0x170   : > { %2971 = vmatpush1.bf16.msra.mxu1 %v2970_v7  ;;  %v3437_v50 = vpop.permute.xlu1 %3436  ;;  %v631_v0 = vsel %vm626_vm8, %v3418_v44, %v3413_v24  ;;  %v632_v1 = vsel %vm626_vm8, %v3419_v43, %v3414_v20  ;;  %v635_v40 = vsel %vm626_vm8, %v3423_v30, %v3418_v44  ;;  %v636_v41 = vsel %vm626_vm8, %v3424_v25, %v3419_v43 }
 0x171   : > { %v3432_v58 = vpop.permute.xlu0 %3431  ;;  %2973 = vmatprep.subr.bf16.mxu1 %v2972_v8  ;;  %v3439_v59 = vunpack.i.h.bf16 %v3437_v50  ;;  %v3438_v63 = vunpack.i.l.bf16 %v3437_v50  ;;  %v2978_v3 = vpack.c.bf16 %v632_v1, %v631_v0  ;;  %v3000_v51 = vpack.c.bf16 %v636_v41, %v635_v40 }
 0x172   : > { %v3434_v55 = vunpack.i.h.bf16 %v3432_v58  ;;  %v3433_v56 = vunpack.i.l.bf16 %v3432_v58 }
 0x173   : > { %v633_v7 = vsel %vm626_vm8, %v3438_v63, %v3428_v49  ;;  %v634_v8 = vsel %vm626_vm8, %v3439_v59, %v3429_v48 }
 0x174   : > { %2975 = vmatpush1.bf16.msra.mxu1 %v2974_v9  ;;  %v629_v38 = vsel %vm626_vm8, %v3428_v49, %v3433_v56  ;;  %v630_v39 = vsel %vm626_vm8, %v3429_v48, %v3434_v55  ;;  %v2982_v9 = vpack.c.bf16 %v634_v8, %v633_v7  ;;  %v637_v57 = vsel %vm626_vm8, %v3433_v56, %v3438_v63 }
 0x175   : > { %2977 = vmatprep.subr.bf16.mxu1 %v2976_v6  ;;  %v2980_v2 = vpack.c.bf16 %v630_v39, %v629_v38 }
 0x178   : > { %2979 = vmatpush1.bf16.msra.mxu1 %v2978_v3 }
 0x179   : > { %2981 = vmatprep.subr.bf16.mxu1 %v2980_v2 }
 0x17c   : > { %2983 = vmatpush1.bf16.msra.mxu1 %v2982_v9 }
 0x17d   : > { %2985 = vmatprep.subr.bf16.mxu1 %v2984_v4 }
 0x17f   : > { %2666 = vmatmul.mubr.msk.f32.vlgmr.msra.gmra.mrb[0].mxu1 %vm667_vm9, %v639_v14 }
 0x180   : > { %2987 = vmatpush3.bf16.msra.mxu1 %v2984_v4  ;;  %750 = vmatprep.mubr.f32.mxu1 %v4017_v10 }
 0x181   : > { %2989 = vmatprep.subr.bf16.mxu1 %v2988_v29  ;;  %v655_v25 = vpop.permute.xlu1 %654 }
 0x183   : > { %2667 = vmatmul.mubr.msk.f32.gmra.mrb[2].mxu1 %vm667_vm9, %v640_v32 }
 0x184   : > { %2991 = vmatpush3.bf16.msra.mxu1 %v2988_v29  ;;  %756 = vmatprep.mubr.f32.mxu1 %v4017_v10 }
 0x185   : > { %2993 = vmatprep.subr.bf16.mxu1 %v4585_v12  ;;  %v4714_v49 = vpop.permute.xlu1 %659 }
 0x187   : > { %2668 = vmatmul.mubr.msk.f32.gmra.mrb[4].mxu1 %vm667_vm9, %v641_v34 }
 0x188   : > { %2995 = vmatpush3.bf16.msra.mxu1 %v4585_v12  ;;  %762 = vmatprep.mubr.f32.mxu1 %v4017_v10  ;;  %v638_v12 = vsel %vm626_vm8, %v3434_v55, %v3439_v59 }
 0x189   : > { %2997 = vmatprep.subr.bf16.mxu1 %v4587_v13  ;;  %v3004_v61 = vpack.c.bf16 %v638_v12, %v637_v57 }
 0x18b   : > { %2669 = vmatmul.mubr.msk.f32.gmra.mrb[6].mxu1 %vm667_vm9, %v642_v36 }
 0x18c   : > { %2999 = vmatpush3.bf16.msra.mxu1 %v4587_v13  ;;  %2834 = vmatprep.mubr.msk.f32.mxu1 %vm667_vm9, %v639_v14  ;;  %v4706_v13 = vpop.permute.xlu0 %649 }
 0x18d   : > { %3001 = vmatprep.subr.bf16.mxu1 %v3000_v51 }
 0x190   : > { %3003 = vmatpush3.bf16.msra.mxu1 %v3000_v51  ;;  %v665_v2 = vpop.permute.xlu0 %664 }
 0x191   : > { %3005 = vmatprep.subr.bf16.mxu1 %v3004_v61 }
 0x194   : > { %3007 = vmatpush3.bf16.msra.mxu1 %v3004_v61 }
 0x197   : > { %2835 = vmatmul.mubr.msk.f32.vlgmr.msra.gmra.mrb[8].mxu1 %vm667_vm9, %v640_v32 }
 0x198   : > { %2837 = vmatprep.mubr.msk.f32.mxu1 %vm667_vm9, %v641_v34 }
 0x19b   : > { %2838 = vmatmul.mubr.msk.f32.gmra.mrb[10].mxu1 %vm667_vm9, %v642_v36 }
 0x252   : > { %v746_v62 = vpop.f32.mrb[0].mxu1 }
 0x253   : > { %v747_v19 = vadd.f32 %v746_v62, %v4706_v13  ;;  %v748_v20 = vpop.f32.mrb[1].mxu1 }
 0x254   : > { %v749_v24 = vadd.f32 %v748_v20, %v4706_v13 }
 0x255   : > { %v854_v30 = vsel %vm4431_vm2, %v747_v19, 0.0 }
 0x256   : > { %v855_v31 = vsel %vm4451_vm7, %v749_v24, 0.0  ;;  %v752_v42 = vpop.f32.mrb[2].mxu1  ;;  %v878_v45 = vmul.f32 0.1, %v854_v30  ;;  %vm866_vm10 = vcmp.ge.f32.partialorder %v854_v30, 0.0 }
 0x257   : > { %v753_v43 = vadd.f32 %v752_v42, %v655_v25  ;;  %v754_v44 = vpop.f32.mrb[3].mxu1  ;;  %v879_v47 = vmul.f32 0.1, %v855_v31  ;;  %vm867_vm11 = vcmp.ge.f32.partialorder %v855_v31, 0.0 }
 0x258   : > { %v755_v48 = vadd.f32 %v754_v44, %v655_v25  ;;  %v4721_v0 = vsel %vm866_vm10, %v854_v30, %v878_v45 }
 0x259   : > { %v857_v50 = vsel %vm4431_vm2, %v753_v43, 0.0  ;;  %v4723_v1 = vsel %vm867_vm11, %v855_v31, %v879_v47 }
 0x25a   : > { %vm869_vm13 = vcmp.ge.f32.partialorder %v857_v50, 0.0  ;;  %v881_v58 = vmul.f32 0.1, %v857_v50  ;;  %v858_v55 = vsel %vm4451_vm7, %v755_v48, 0.0  ;;  %v758_v56 = vpop.f32.mrb[4].mxu1 }
 0x25b   : > { %vm870_vm14 = vcmp.ge.f32.partialorder %v858_v55, 0.0  ;;  %v882_v6 = vmul.f32 0.1, %v858_v55  ;;  %v760_v59 = vpop.f32.mrb[5].mxu1  ;;  %v759_v63 = vadd.f32 %v758_v56, %v4714_v49 }
 0x25c   : > { %v4725_v38 = vsel %vm869_vm13, %v857_v50, %v881_v58  ;;  %v761_v39 = vadd.f32 %v760_v59, %v4714_v49 }
 0x25d   : > { %v4728_v3 = vsel %vm870_vm14, %v858_v55, %v882_v6  ;;  %v4732_v7 = vpack.i.bf16 %v4725_v38, %v4721_v0  ;;  %v860_v8 = vsel %vm4431_vm2, %v759_v63, 0.0  ;;  %v3018_v34 = vpack.c.bf16 %v4725_v38, %v4721_v0 }
 0x25e   : > { %v764_v26 = vpop.f32.mrb[6].mxu1  ;;  %v861_v27 = vsel %vm4451_vm7, %v761_v39, 0.0  ;;  %v884_v9 = vmul.f32 0.1, %v860_v8  ;;  %v3447_v4 = vpack.i.bf16 %v4728_v3, %v4723_v1  ;;  %vm872_vm15 = vcmp.ge.f32.partialorder %v860_v8, 0.0 }
 0x25f   : > { %3443 = vrot.lane.b32.xlu1 %v4732_v7, %s4015_s6  ;;  %v885_v14 = vmul.f32 0.1, %v861_v27  ;;  %v765_v17 = vadd.f32 %v764_v26, %v665_v2  ;;  %v766_v18 = vpop.f32.mrb[7].mxu1  ;;  %vm873_vm0 = vcmp.ge.f32.partialorder %v861_v27, 0.0  ;;  %v3016_v32 = vpack.c.bf16 %v4728_v3, %v4723_v1 }
 0x260   : > { %v767_v29 = vadd.f32 %v766_v18, %v665_v2  ;;  %3448 = vrot.lane.b32.xlu0 %v3447_v4, %s4015_s6  ;;  %v4751_v51 = vsel %vm872_vm15, %v860_v8, %v884_v9  ;;  %v979_v18 = vld [vmem:[%s5809_s24 + $0x8] sm:$0xff]  ;;  %s4022_s24 = smov 123  }
 0x261   : > { %v863_v36 = vsel %vm4431_vm2, %v765_v17, 0.0  ;;  %v4753_v12 = vsel %vm873_vm0, %v861_v27, %v885_v14  ;;  %v4790_v17 = vld [vmem:[#allocation9] sm:$0xff] }
 0x262   : > { %vm875_vm1 = vcmp.ge.f32.partialorder %v863_v36, 0.0  ;;  %v887_v40 = vmul.f32 0.1, %v863_v36  ;;  %v864_v41 = vsel %vm4451_vm7, %v767_v29, 0.0  ;;  %2864 = vmatprep.mubr.msk.f32.mxu1 %vm667_vm9, %v4790_v17  ;;  %v980_v29 = vld [vmem:[%s5810_s17 + $0x10] sm:$0xff] }
 0x263   : > { %vm876_vm3 = vcmp.ge.f32.partialorder %v864_v41, 0.0  ;;  %v888_v57 = vmul.f32 0.1, %v864_v41 }
 0x264   : > { %v4755_v61 = vsel %vm875_vm1, %v863_v36, %v887_v40 }
 0x265   : > { %v4757_v62 = vsel %vm876_vm3, %v864_v41, %v888_v57  ;;  %v3452_v19 = vpack.i.bf16 %v4755_v61, %v4751_v51  ;;  %v3022_v20 = vpack.c.bf16 %v4755_v61, %v4751_v51  ;;  %v975_v61 = vld [vmem:[#allocation9 + $0x8] sm:$0xff] }
 0x266   : > { %v3462_v24 = vpack.i.bf16 %v4757_v62, %v4753_v12  ;;  %v3020_v30 = vpack.c.bf16 %v4757_v62, %v4753_v12 }
 0x267   : > { %3453 = vrot.lane.b32.xlu0 %v3452_v19, %s4015_s6 }
 0x26a   : > { %v2836_v31 = vpop.f32.mrb[8].mxu1 }
 0x26b   : > { %v841_v42 = vadd.f32 %v2836_v31, %v655_v25  ;;  %v835_v43 = vpop.f32.mrb[9].mxu1 }
 0x26c   : > { %v836_v44 = vadd.f32 %v835_v43, %v4706_v13 }
 0x26d   : > { %v859_v45 = vsel %vm4473_vm12, %v841_v42, 0.0 }
 0x26e   : > { %vm871_vm4 = vcmp.ge.f32.partialorder %v859_v45, 0.0  ;;  %v883_v47 = vmul.f32 0.1, %v859_v45  ;;  %v856_v48 = vsel %vm4473_vm12, %v836_v44, 0.0  ;;  %v2839_v50 = vpop.f32.mrb[10].mxu1 }
 0x26f   : > { %vm868_vm5 = vcmp.ge.f32.partialorder %v856_v48, 0.0  ;;  %v880_v58 = vmul.f32 0.1, %v856_v48  ;;  %v851_v55 = vadd.f32 %v2839_v50, %v665_v2  ;;  %v845_v56 = vpop.f32.mrb[11].mxu1 }
 0x270   : > { %v895_v6 = vsel %vm871_vm4, %v859_v45, %v883_v47  ;;  %v846_v59 = vadd.f32 %v845_v56, %v4714_v49 }
 0x271   : > { %v892_v25 = vsel %vm868_vm5, %v856_v48, %v880_v58  ;;  %v865_v13 = vsel %vm4473_vm12, %v851_v55, 0.0 }
 0x272   : > { %vm877_vm10 = vcmp.ge.f32.partialorder %v865_v13, 0.0  ;;  %v889_v63 = vmul.f32 0.1, %v865_v13  ;;  %v862_v39 = vsel %vm4473_vm12, %v846_v59, 0.0  ;;  %v3457_v8 = vpack.i.bf16 %v895_v6, %v892_v25 }
 0x273   : > { %vm874_vm11 = vcmp.ge.f32.partialorder %v862_v39, 0.0  ;;  %v886_v26 = vmul.f32 0.1, %v862_v39  ;;  %v4778_v27 = vpack.c.bf16 %v895_v6, %v892_v25 }
 0x274   : > { %v901_v9 = vsel %vm877_vm10, %v865_v13, %v889_v63  ;;  %3458 = vrot.lane.b32.xlu1 %v3457_v8, %s4015_s6 }
 0x275   : > { %v898_v2 = vsel %vm874_vm11, %v862_v39, %v886_v26 }
 0x276   : > { %v3467_v14 = vpack.i.bf16 %v901_v9, %v898_v2  ;;  %v4781_v49 = vpack.c.bf16 %v901_v9, %v898_v2 }
 0x278   : > { %3468 = vrot.lane.b32.xlu0 %v3467_v14, %s4015_s6  ;;  %3463 = vrot.lane.b32.xlu1 %v3462_v24, %s4015_s6 }
 0x27c   : > { %3478 = vrot.lane.b32.xlu0 %v3457_v8, %s4016_s14  ;;  %3473 = vrot.lane.b32.xlu1 %v3447_v4, %s4016_s14  ;;  %v978_v4 = vld [vmem:[%s5810_s17] sm:$0xff] }
 0x280   : > { %3488 = vrot.lane.b32.xlu0 %v3462_v24, %s4016_s14  ;;  %3483 = vrot.lane.b32.xlu1 %v4732_v7, %s4016_s14  ;;  %v981_v7 = vld [vmem:[%s5810_s17 + $0x18] sm:$0xff] }
 0x284   : > { %3498 = vrot.lane.b32.xlu0 %v3452_v19, %s4016_s14  ;;  %3493 = vrot.lane.b32.xlu1 %v3467_v14, %s4016_s14 }
 0x288   : > { %989 = vperm.xlu0 %3440, %v979_v18   ;;  %984 = vperm.xlu1 %3441, %v978_v4  }
 0x28c   : > { %999 = vperm.xlu0 %3440, %v981_v7   ;;  %994 = vperm.xlu1 %3441, %v980_v29  }
 0x2d1   : > { %v3444_v36 = vpop.permute.xlu1 %3443 }
 0x2d2   : > { %v3446_v40 = vunpack.i.h.bf16 %v3444_v36  ;;  %v3445_v41 = vunpack.i.l.bf16 %v3444_v36  ;;  %v3449_v57 = vpop.permute.xlu0 %3448 }
 0x2d3   : > { %v3451_v19 = vunpack.i.h.bf16 %v3449_v57  ;;  %v3450_v24 = vunpack.i.l.bf16 %v3449_v57 }
 0x2d5   : > { %v930_v31 = vsel %vm589_vm6, %v3445_v41, %v3450_v24  ;;  %v931_v42 = vsel %vm589_vm6, %v3446_v40, %v3451_v19 }
 0x2d6   : > { %v3008_v43 = vpack.c.bf16 %v931_v42, %v930_v31 }
 0x2d8   : > { %3009 = vmatprep.subr.bf16.mxu0 %v3008_v43 }
 0x2d9   : > { %v3454_v44 = vpop.permute.xlu0 %3453 }
 0x2da   : > { %v3456_v6 = vunpack.i.h.bf16 %v3454_v44  ;;  %v3455_v59 = vunpack.i.l.bf16 %v3454_v44 }
 0x2e6   : > { %v3459_v45 = vpop.permute.xlu1 %3458 }
 0x2e7   : > { %v3461_v47 = vunpack.i.h.bf16 %v3459_v45  ;;  %v3460_v48 = vunpack.i.l.bf16 %v3459_v45 }
 0x2e9   : > { %v934_v50 = vsel %vm589_vm6, %v3460_v48, %v3445_v41  ;;  %v935_v58 = vsel %vm589_vm6, %v3461_v47, %v3446_v40  ;;  %v926_v55 = vsel %vm589_vm6, %v3450_v24, %v3460_v48  ;;  %v927_v56 = vsel %vm589_vm6, %v3451_v19, %v3461_v47 }
 0x2ea   : > { %v3469_v25 = vpop.permute.xlu0 %3468  ;;  %v3464_v13 = vpop.permute.xlu1 %3463  ;;  %v3010_v63 = vpack.c.bf16 %v935_v58, %v934_v50  ;;  %v3032_v39 = vpack.c.bf16 %v927_v56, %v926_v55 }
 0x2eb   : > { %v3471_v8 = vunpack.i.h.bf16 %v3469_v25  ;;  %v3470_v26 = vunpack.i.l.bf16 %v3469_v25  ;;  %v3466_v9 = vunpack.i.h.bf16 %v3464_v13  ;;  %v3465_v2 = vunpack.i.l.bf16 %v3464_v13 }
 0x2ec   : > { %3011 = vmatpush1.bf16.msra.mxu0 %v3010_v63  ;;  %3033 = vmatprep.subr.bf16.mxu1 %v3032_v39 }
 0x2ed   : > { %3035 = vmatpush3.bf16.msra.mxu1 %v3032_v39  ;;  %v932_v14 = vsel %vm589_vm6, %v3455_v59, %v3465_v2  ;;  %v933_v18 = vsel %vm589_vm6, %v3456_v6, %v3466_v9  ;;  %v928_v4 = vsel %vm589_vm6, %v3465_v2, %v3470_v26  ;;  %v929_v7 = vsel %vm589_vm6, %v3466_v9, %v3471_v8 }
 0x2ee   : > { %v3479_v29 = vpop.permute.xlu0 %3478  ;;  %v3474_v36 = vpop.permute.xlu1 %3473  ;;  %v3012_v40 = vpack.c.bf16 %v933_v18, %v932_v14  ;;  %v3036_v41 = vpack.c.bf16 %v929_v7, %v928_v4  ;;  %v936_v57 = vsel %vm589_vm6, %v3470_v26, %v3455_v59  ;;  %v937_v19 = vsel %vm589_vm6, %v3471_v8, %v3456_v6  ;;  %v977_v18 = vld [vmem:[#allocation9 + $0x18] sm:$0xff] }
 0x2ef   : > { %v3014_v24 = vpack.c.bf16 %v937_v19, %v936_v57  ;;  %v3481_v31 = vunpack.i.h.bf16 %v3479_v29  ;;  %v3480_v42 = vunpack.i.l.bf16 %v3479_v29  ;;  %v3476_v43 = vunpack.i.h.bf16 %v3474_v36 }
 0x2f0   : > { %3013 = vmatprep.subr.bf16.mxu0 %v3012_v40  ;;  %3037 = vmatprep.subr.bf16.mxu1 %v3036_v41  ;;  %v3475_v44 = vunpack.i.l.bf16 %v3474_v36 }
 0x2f1   : > { %3039 = vmatpush3.bf16.msra.mxu1 %v3036_v41  ;;  %3015 = vmatpush1.bf16.msra.mxu0 %v3014_v24  ;;  %v963_v55 = vsel %vm626_vm8, %v3476_v43, %v3481_v31 }
 0x2f2   : > { %v3489_v45 = vpop.permute.xlu0 %3488  ;;  %v3484_v47 = vpop.permute.xlu1 %3483  ;;  %3041 = vmatprep.subr.bf16.mxu1 %v4778_v27  ;;  %3017 = vmatprep.subr.bf16.mxu0 %v3016_v32  ;;  %v962_v58 = vsel %vm626_vm8, %v3475_v44, %v3480_v42 }
 0x2f3   : > { %v3486_v48 = vunpack.i.h.bf16 %v3484_v47  ;;  %v3485_v50 = vunpack.i.l.bf16 %v3484_v47  ;;  %v3491_v13 = vunpack.i.h.bf16 %v3489_v45  ;;  %v3490_v63 = vunpack.i.l.bf16 %v3489_v45 }
 0x2f4   : > { %v3024_v39 = vpack.c.bf16 %v963_v55, %v962_v58 }
 0x2f5   : > { %3043 = vmatpush3.bf16.msra.mxu1 %v4778_v27  ;;  %v970_v56 = vsel %vm626_vm8, %v3480_v42, %v3485_v50  ;;  %v971_v6 = vsel %vm626_vm8, %v3481_v31, %v3486_v48  ;;  %3019 = vmatpush1.bf16.msra.mxu0 %v3018_v34  ;;  %v966_v0 = vsel %vm626_vm8, %v3485_v50, %v3475_v44 }
 0x2f6   : > { %v3499_v1 = vpop.permute.xlu0 %3498  ;;  %v3494_v3 = vpop.permute.xlu1 %3493  ;;  %3045 = vmatprep.subr.bf16.mxu1 %v4781_v49  ;;  %3021 = vmatprep.subr.bf16.mxu0 %v3020_v30  ;;  %v3048_v8 = vpack.c.bf16 %v971_v6, %v970_v56  ;;  %v967_v38 = vsel %vm626_vm8, %v3486_v48, %v3476_v43 }
 0x2f7   : > { %v3501_v32 = vunpack.i.h.bf16 %v3499_v1  ;;  %v3500_v27 = vunpack.i.l.bf16 %v3499_v1  ;;  %v3496_v59 = vunpack.i.h.bf16 %v3494_v3  ;;  %v3495_v25 = vunpack.i.l.bf16 %v3494_v3 }
 0x2f8   : > { %v3026_v30 = vpack.c.bf16 %v967_v38, %v966_v0 }
 0x2f9   : > { %3047 = vmatpush3.bf16.msra.mxu1 %v4781_v49  ;;  %v972_v34 = vsel %vm626_vm8, %v3495_v25, %v3500_v27  ;;  %v973_v26 = vsel %vm626_vm8, %v3496_v59, %v3501_v32  ;;  %3023 = vmatpush1.bf16.msra.mxu0 %v3022_v20  ;;  %v964_v12 = vsel %vm626_vm8, %v3490_v63, %v3495_v25  ;;  %v976_v20 = vld [vmem:[#allocation9 + $0x10] sm:$0xff] }
 0x2fa   : > { %3049 = vmatprep.subr.bf16.mxu1 %v3048_v8  ;;  %v965_v62 = vsel %vm626_vm8, %v3491_v13, %v3496_v59  ;;  %3025 = vmatprep.subr.bf16.mxu0 %v3024_v39  ;;  %v3052_v49 = vpack.c.bf16 %v973_v26, %v972_v34  ;;  %v968_v2 = vsel %vm626_vm8, %v3500_v27, %v3490_v63 }
 0x2fb   : > { %v3028_v9 = vpack.c.bf16 %v965_v62, %v964_v12  ;;  %v969_v14 = vsel %vm626_vm8, %v3501_v32, %v3491_v13 }
 0x2fc   : > { %v3030_v51 = vpack.c.bf16 %v969_v14, %v968_v2 }
 0x2fd   : > { %3051 = vmatpush3.bf16.msra.mxu1 %v3048_v8  ;;  %3027 = vmatpush1.bf16.msra.mxu0 %v3026_v30 }
 0x2fe   : > { %3053 = vmatprep.subr.bf16.mxu1 %v3052_v49  ;;  %3029 = vmatprep.subr.bf16.mxu0 %v3028_v9 }
 0x301   : > { %3055 = vmatpush3.bf16.msra.mxu1 %v3052_v49  ;;  %3031 = vmatpush1.bf16.msra.mxu0 %v3030_v51 }
 0x304   : > { %2865 = vmatmul.mubr.msk.f32.vlgmr.msra.gmra.mrb[12].mxu1 %vm667_vm9, %v975_v61  ;;  %2674 = vmatmul.mubr.msk.f32.vlgmr.msra.gmra.mrb[0].mxu0 %vm667_vm9, %v4790_v17 }
 0x305   : > { %2867 = vmatprep.mubr.msk.f32.mxu1 %vm667_vm9, %v976_v20  ;;  %1084 = vmatprep.mubr.f32.mxu0 %v4017_v10 }
 0x307   : > { %v990_v17 = vpop.permute.xlu0 %989  ;;  %v985_v4 = vpop.permute.xlu1 %984 }
 0x308   : > { %2868 = vmatmul.mubr.msk.f32.gmra.mrb[14].mxu1 %vm667_vm9, %v977_v18  ;;  %2675 = vmatmul.mubr.msk.f32.gmra.mrb[2].mxu0 %vm667_vm9, %v975_v61 }
 0x309   : > { %1090 = vmatprep.mubr.f32.mxu0 %v4017_v10 }
 0x30b   : > { %v1000_v24 = vpop.permute.xlu0 %999  ;;  %v995_v43 = vpop.permute.xlu1 %994 }
 0x30c   : > { %2676 = vmatmul.mubr.msk.f32.gmra.mrb[4].mxu0 %vm667_vm9, %v976_v20 }
 0x30d   : > { %1096 = vmatprep.mubr.f32.mxu0 %v4017_v10 }
 0x310   : > { %2677 = vmatmul.mubr.msk.f32.gmra.mrb[6].mxu0 %vm667_vm9, %v977_v18 }
 0x311   : > { %1428 = vmatprep.mubr.f32.mxu0 %v4017_v10 }
 0x3d7   : > { %v2866_v7 = vpop.f32.mrb[12].mxu1  ;;  %v1080_v29 = vpop.f32.mrb[0].mxu0 }
 0x3d8   : > { %v1175_v36 = vadd.f32 %v2866_v7, %v990_v17  ;;  %v1169_v40 = vpop.f32.mrb[13].mxu1  ;;  %v1081_v41 = vadd.f32 %v1080_v29, %v985_v4  ;;  %v1082_v57 = vpop.f32.mrb[1].mxu0 }
 0x3d9   : > { %v1170_v19 = vadd.f32 %v1169_v40, %v985_v4  ;;  %v1083_v42 = vadd.f32 %v1082_v57, %v985_v4 }
 0x3da   : > { %v1193_v31 = vsel %vm4473_vm12, %v1175_v36, 0.0  ;;  %v1188_v44 = vsel %vm4431_vm2, %v1081_v41, 0.0 }
 0x3db   : > { %v4889_v45 = vadd.f32 %v1193_v31, %v4489_v35  ;;  %v1190_v47 = vsel %vm4473_vm12, %v1170_v19, 0.0  ;;  %v2869_v48 = vpop.f32.mrb[14].mxu1  ;;  %v1189_v50 = vsel %vm4451_vm7, %v1083_v42, 0.0  ;;  %v1086_v55 = vpop.f32.mrb[2].mxu0  ;;  %v4899_v1 = vadd.f32 %v1188_v44, %v4457_v22 }
 0x3dc   : > { %v4896_v58 = vadd.f32 %v1190_v47, %v4484_v33  ;;  %v1185_v56 = vadd.f32 %v2869_v48, %v1000_v24  ;;  %v1179_v6 = vpop.f32.mrb[15].mxu1  ;;  %v4902_v3 = vadd.f32 %v1189_v50, %v4495_v37  ;;  %v1087_v35 = vadd.f32 %v1086_v55, %v990_v17  ;;  %v1088_v32 = vpop.f32.mrb[3].mxu0 }
 0x3dd   : > { %v1180_v27 = vadd.f32 %v1179_v6, %v995_v43  ;;  %v1089_v59 = vadd.f32 %v1088_v32, %v990_v17  ;;  %vm1217_vm14 = vcmp.ge.f32.partialorder %v4889_v45, 0.0  ;;  %v1229_v13 = vmul.f32 0.1, %v4889_v45 }
 0x3de   : > { %vm1214_vm13 = vcmp.ge.f32.partialorder %v4896_v58, 0.0  ;;  %v1226_v33 = vmul.f32 0.1, %v4896_v58  ;;  %v1191_v25 = vsel %vm4431_vm2, %v1087_v35, 0.0  ;;  %v1199_v22 = vsel %vm4473_vm12, %v1185_v56, 0.0 }
 0x3df   : > { %v1196_v37 = vsel %vm4473_vm12, %v1180_v27, 0.0  ;;  %v4915_v63 = vadd.f32 %v1191_v25, %v4461_v23  ;;  %v1192_v39 = vsel %vm4451_vm7, %v1089_v59, 0.0  ;;  %v1092_v0 = vpop.f32.mrb[4].mxu0  ;;  %v1241_v62 = vsel %vm1217_vm14, %v4889_v45, %v1229_v13 }
 0x3e0   : > { %v4920_v8 = vadd.f32 %v1196_v37, %v4525_v52  ;;  %v1238_v38 = vsel %vm1214_vm13, %v4896_v58, %v1226_v33  ;;  %v4924_v34 = vadd.f32 %v1192_v39, %v4514_v46  ;;  %v1093_v26 = vadd.f32 %v1092_v0, %v995_v43  ;;  %v1094_v12 = vpop.f32.mrb[5].mxu0  ;;  %v5026_v39 = vld [vmem:[#allocation8 + $0x20] sm:$0xff] }
 0x3e1   : > { %vm1213_vm15 = vcmp.ge.f32.partialorder %v4902_v3, 0.0  ;;  %v1095_v23 = vadd.f32 %v1094_v12, %v995_v43  ;;  %v3502_v30 = vpack.i.bf16 %v1241_v62, %v1238_v38  ;;  %v1225_v49 = vmul.f32 0.1, %v4902_v3  ;;  %v2682_v0 = vld [vmem:[%s5808_s23 + $0x20] sm:$0xff]  ;;  %2894 = vmatprep.mubr.msk.f32.mxu1 %vm667_vm9, %v5026_v39  ;;  %v2685_v12 = vld [vmem:[%s5808_s23 + $0x38] sm:$0xff] }
 0x3e2   : > { %vm1212_vm0 = vcmp.ge.f32.partialorder %v4899_v1, 0.0  ;;  %v1194_v52 = vsel %vm4431_vm2, %v1093_v26, 0.0  ;;  %vm1216_vm1 = vcmp.ge.f32.partialorder %v4924_v34, 0.0  ;;  %v1228_v46 = vmul.f32 0.1, %v4924_v34  ;;  %v2684_v26 = vld [vmem:[%s5808_s23 + $0x30] sm:$0xff] }
 0x3e3   : > { %vm1215_vm3 = vcmp.ge.f32.partialorder %v4915_v63, 0.0  ;;  %v4936_v9 = vadd.f32 %v1194_v52, %v4439_v15  ;;  %v1195_v2 = vsel %vm4451_vm7, %v1095_v23, 0.0  ;;  %3503 = vrot.lane.b32.xlu1 %v3502_v30, %s4019_s15  ;;  %v1098_v14 = vpop.f32.mrb[6].mxu0  ;;  %v4942_v51 = vsel %vm1213_vm15, %v4902_v3, %v1225_v49 }
 0x3e4   : > { %v1224_v61 = vmul.f32 0.1, %v4899_v1  ;;  %v4946_v20 = vadd.f32 %v1195_v2, %v4533_v54  ;;  %v1099_v18 = vadd.f32 %v1098_v14, %v1000_v24  ;;  %v1100_v17 = vpop.f32.mrb[7].mxu0  ;;  %v4949_v15 = vsel %vm1216_vm1, %v4924_v34, %v1228_v46 }
 0x3e5   : > { %v1227_v4 = vmul.f32 0.1, %v4915_v63  ;;  %v4953_v7 = vadd.f32 %v1199_v22, %v4529_v53  ;;  %v1101_v29 = vadd.f32 %v1100_v17, %v1000_v24  ;;  %v3512_v36 = vpack.i.bf16 %v4949_v15, %v4942_v51 }
 0x3e6   : > { %v1197_v40 = vsel %vm4431_vm2, %v1099_v18, 0.0  ;;  %v4962_v54 = vsel %vm1212_vm0, %v4899_v1, %v1224_v61  ;;  %v1230_v53 = vmul.f32 0.1, %v4936_v9  ;;  %v1231_v31 = vmul.f32 0.1, %v4946_v20 }
 0x3e7   : > { %v4967_v41 = vsel %vm1215_vm3, %v4915_v63, %v1227_v4  ;;  %v4971_v57 = vadd.f32 %v1197_v40, %v4443_v16  ;;  %v1198_v19 = vsel %vm4451_vm7, %v1101_v29, 0.0  ;;  %3513 = vrot.lane.b32.xlu0 %v3512_v36, %s4019_s15  ;;  %vm1218_vm4 = vcmp.ge.f32.partialorder %v4936_v9, 0.0 }
 0x3e8   : > { %v3507_v24 = vpack.i.bf16 %v4967_v41, %v4962_v54  ;;  %v4980_v42 = vadd.f32 %v1198_v19, %v4550_v60  ;;  %vm1219_vm5 = vcmp.ge.f32.partialorder %v4946_v20, 0.0  ;;  %vm1220_vm10 = vcmp.ge.f32.partialorder %v4920_v8, 0.0 }
 0x3e9   : > { %vm1221_vm11 = vcmp.ge.f32.partialorder %v4971_v57, 0.0  ;;  %v1233_v16 = vmul.f32 0.1, %v4971_v57  ;;  %vm1223_vm13 = vcmp.ge.f32.partialorder %v4953_v7, 0.0  ;;  %v1232_v43 = vmul.f32 0.1, %v4920_v8 }
 0x3ea   : > { %3508 = vrot.lane.b32.xlu1 %v3507_v24, %s4019_s15  ;;  %vm1222_vm14 = vcmp.ge.f32.partialorder %v4980_v42, 0.0  ;;  %v1234_v60 = vmul.f32 0.1, %v4980_v42  ;;  %v1235_v44 = vmul.f32 0.1, %v4953_v7  ;;  %v4994_v47 = vsel %vm1218_vm4, %v4936_v9, %v1230_v53 }
 0x3eb   : > { %v4997_v48 = vsel %vm1221_vm11, %v4971_v57, %v1233_v16  ;;  %v5000_v50 = vsel %vm1219_vm5, %v4946_v20, %v1231_v31  ;;  %v1244_v6 = vsel %vm1220_vm10, %v4920_v8, %v1232_v43  ;;  %v3064_v27 = vpack.c.bf16 %v4949_v15, %v4942_v51 }
 0x3ec   : > { %v3517_v55 = vpack.i.bf16 %v4997_v48, %v4994_v47  ;;  %v5005_v56 = vsel %vm1222_vm14, %v4980_v42, %v1234_v60  ;;  %v1247_v35 = vsel %vm1223_vm13, %v4953_v7, %v1235_v44  ;;  %v5014_v59 = vpack.c.bf16 %v1241_v62, %v1238_v38  ;;  %v2683_v38 = vld [vmem:[%s5808_s23 + $0x28] sm:$0xff] }
 0x3ed   : > { %v3522_v32 = vpack.i.bf16 %v5005_v56, %v5000_v50  ;;  %v3066_v33 = vpack.c.bf16 %v4967_v41, %v4962_v54  ;;  %v3068_v25 = vpack.c.bf16 %v5005_v56, %v5000_v50  ;;  %v5021_v22 = vpack.c.bf16 %v1247_v35, %v1244_v6 }
 0x3ee   : > { %3518 = vrot.lane.b32.xlu0 %v3517_v55, %s4019_s15  ;;  %v3070_v37 = vpack.c.bf16 %v4997_v48, %v4994_v47  ;;  %v3527_v13 = vpack.i.bf16 %v1247_v35, %v1244_v6  ;;  %vm1272_vm15 = vcmp.lt.s32.totalorder %v4426_v5, 3  ;;  %vm1309_vm0 = vcmp.lt.s32.totalorder %v4426_v5, 125 }
 0x3ef   : > { %3523 = vrot.lane.b32.xlu1 %v3522_v32, %s4019_s15 }
 0x3f2   : > { %3528 = vrot.lane.b32.xlu0 %v3527_v13, %s4019_s15  ;;  %s5812_s15 = sld [smem:[#allocation31_spill]] }
 0x3f3   : > { %3533 = vrot.lane.b32.xlu1 %v3512_v36, %s4020_s19 }
 0x3f6   : > { %3538 = vrot.lane.b32.xlu0 %v3502_v30, %s4020_s19 }
 0x3f7   : > { %3543 = vrot.lane.b32.xlu1 %v3507_v24, %s4020_s19 }
 0x3f8   : > { %p5814_p12 = scmp.ne.s32.totalorder %s5812_s15, 0 }
 0x3fa   : > { %3553 = vrot.lane.b32.xlu0 %v3522_v32, %s4020_s19 }
 0x3fb   : > { %3548 = vrot.lane.b32.xlu1 %v3527_v13, %s4020_s19 }
 0x3fe   : > { %3558 = vrot.lane.b32.xlu0 %v3517_v55, %s4020_s19 }
 0x3ff   : > { %1334 = vperm.xlu1 %3441, %v2682_v0  }
 0x402   : > { %1339 = vperm.xlu0 %3440, %v2683_v38  }
 0x403   : > { %1344 = vperm.xlu1 %3441, %v2684_v26  }
 0x406   : > { %1349 = vperm.xlu0 %3440, %v2685_v12  }
 0x455   : > { %v3504_v62 = vpop.permute.xlu1 %3503 }
 0x456   : > { %v3506_v30 = vunpack.i.h.bf16 %v3504_v62  ;;  %v3505_v49 = vunpack.i.l.bf16 %v3504_v62 }
 0x459   : > { %v3514_v23 = vpop.permute.xlu0 %3513 }
 0x45a   : > { %v3516_v52 = vunpack.i.h.bf16 %v3514_v23  ;;  %v3515_v46 = vunpack.i.l.bf16 %v3514_v23 }
 0x45c   : > { %v3509_v2 = vpop.permute.xlu1 %3508  ;;  %v1273_v18 = vsel %vm1272_vm15, %v3515_v46, %v3505_v49  ;;  %v1274_v17 = vsel %vm1272_vm15, %v3516_v52, %v3506_v30 }
 0x45d   : > { %v3511_v14 = vunpack.i.h.bf16 %v3509_v2  ;;  %v3510_v61 = vunpack.i.l.bf16 %v3509_v2  ;;  %v3080_v4 = vpack.c.bf16 %v1274_v17, %v1273_v18 }
 0x45f   : > { %v1282_v29 = vsel %vm1272_vm15, %v3506_v30, %v3511_v14  ;;  %v1281_v36 = vsel %vm1272_vm15, %v3505_v49, %v3510_v61  ;;  %v1277_v40 = vsel %vm1272_vm15, %v3510_v61, %v3515_v46  ;;  %v1278_v53 = vsel %vm1272_vm15, %v3511_v14, %v3516_v52  ;;  %3081 = vmatprep.subr.bf16.mxu1 %v3080_v4 }
 0x460   : > { %v3058_v19 = vpack.c.bf16 %v1282_v29, %v1281_v36  ;;  %v3056_v24 = vpack.c.bf16 %v1278_v53, %v1277_v40  ;;  %v3519_v31 = vpop.permute.xlu0 %3518  ;;  %3083 = vmatpush3.bf16.msra.mxu1 %v3080_v4 }
 0x461   : > { %v3521_v16 = vunpack.i.h.bf16 %v3519_v31  ;;  %v3520_v43 = vunpack.i.l.bf16 %v3519_v31  ;;  %v3524_v60 = vpop.permute.xlu1 %3523 }
 0x462   : > { %3057 = vmatprep.subr.bf16.mxu0 %v3056_v24  ;;  %v3526_v44 = vunpack.i.h.bf16 %v3524_v60  ;;  %v3525_v55 = vunpack.i.l.bf16 %v3524_v60 }
 0x463   : > { %3059 = vmatpush1.bf16.msra.mxu0 %v3058_v19 }
 0x464   : > { %v3529_v6 = vpop.permute.xlu0 %3528  ;;  %v1279_v35 = vsel %vm1272_vm15, %v3520_v43, %v3525_v55  ;;  %v1280_v32 = vsel %vm1272_vm15, %v3521_v16, %v3526_v44 }
 0x465   : > { %v3531_v13 = vunpack.i.h.bf16 %v3529_v6  ;;  %v3530_v0 = vunpack.i.l.bf16 %v3529_v6  ;;  %v3534_v38 = vpop.permute.xlu1 %3533  ;;  %v3060_v26 = vpack.c.bf16 %v1280_v32, %v1279_v35  ;;  %v1324_v32 = vld [vmem:[#allocation8 + $0x28] sm:$0xff] }
 0x466   : > { %v3536_v18 = vunpack.i.h.bf16 %v3534_v38  ;;  %v3535_v17 = vunpack.i.l.bf16 %v3534_v38 }
 0x467   : > { %v1283_v12 = vsel %vm1272_vm15, %v3530_v0, %v3520_v43  ;;  %v1284_v62 = vsel %vm1272_vm15, %v3531_v13, %v3521_v16  ;;  %3061 = vmatprep.subr.bf16.mxu0 %v3060_v26  ;;  %v1275_v23 = vsel %vm1272_vm15, %v3525_v55, %v3530_v0  ;;  %v1276_v30 = vsel %vm1272_vm15, %v3526_v44, %v3531_v13  ;;  %v1325_v13 = vld [vmem:[#allocation8 + $0x30] sm:$0xff]  ;;  %v1326_v0 = vld [vmem:[#allocation8 + $0x38] sm:$0xff] }
 0x468   : > { %v3062_v49 = vpack.c.bf16 %v1284_v62, %v1283_v12  ;;  %v3539_v52 = vpop.permute.xlu0 %3538  ;;  %v3084_v46 = vpack.c.bf16 %v1276_v30, %v1275_v23 }
 0x469   : > { %v3541_v2 = vunpack.i.h.bf16 %v3539_v52  ;;  %v3540_v14 = vunpack.i.l.bf16 %v3539_v52  ;;  %v3544_v61 = vpop.permute.xlu1 %3543 }
 0x46a   : > { %3063 = vmatpush1.bf16.msra.mxu0 %v3062_v49  ;;  %3085 = vmatprep.subr.bf16.mxu1 %v3084_v46  ;;  %v3546_v4 = vunpack.i.h.bf16 %v3544_v61  ;;  %v3545_v29 = vunpack.i.l.bf16 %v3544_v61 }
 0x46b   : > { %3065 = vmatprep.subr.bf16.mxu0 %v3064_v27  ;;  %3087 = vmatpush3.bf16.msra.mxu1 %v3084_v46  ;;  %v1310_v53 = vsel %vm1309_vm0, %v3535_v17, %v3540_v14  ;;  %v1311_v19 = vsel %vm1309_vm0, %v3536_v18, %v3541_v2 }
 0x46c   : > { %v3554_v36 = vpop.permute.xlu0 %3553  ;;  %3089 = vmatprep.subr.bf16.mxu1 %v5014_v59  ;;  %v1318_v51 = vsel %vm1309_vm0, %v3540_v14, %v3545_v29  ;;  %v1319_v15 = vsel %vm1309_vm0, %v3541_v2, %v3546_v4  ;;  %v1314_v27 = vsel %vm1309_vm0, %v3545_v29, %v3535_v17  ;;  %v1315_v54 = vsel %vm1309_vm0, %v3546_v4, %v3536_v18 }
 0x46d   : > { %v3549_v40 = vpop.permute.xlu1 %3548  ;;  %v3556_v24 = vunpack.i.h.bf16 %v3554_v36  ;;  %v3555_v31 = vunpack.i.l.bf16 %v3554_v36  ;;  %v3072_v56 = vpack.c.bf16 %v1311_v19, %v1310_v53  ;;  %v3074_v55 = vpack.c.bf16 %v1315_v54, %v1314_v27 }
 0x46e   : > { %v3551_v16 = vunpack.i.h.bf16 %v3549_v40  ;;  %v3550_v43 = vunpack.i.l.bf16 %v3549_v40  ;;  %3067 = vmatpush1.bf16.msra.mxu0 %v3066_v33 }
 0x46f   : > { %3069 = vmatprep.subr.bf16.mxu0 %v3068_v25  ;;  %3091 = vmatpush3.bf16.msra.mxu1 %v5014_v59  ;;  %v3096_v59 = vpack.c.bf16 %v1319_v15, %v1318_v51 }
 0x470   : > { %v3559_v60 = vpop.permute.xlu0 %3558  ;;  %3093 = vmatprep.subr.bf16.mxu1 %v5021_v22  ;;  %v1312_v33 = vsel %vm1309_vm0, %v3555_v31, %v3550_v43  ;;  %v1313_v25 = vsel %vm1309_vm0, %v3556_v24, %v3551_v16 }
 0x471   : > { %v3561_v41 = vunpack.i.h.bf16 %v3559_v60  ;;  %v3560_v50 = vunpack.i.l.bf16 %v3559_v60 }
 0x472   : > { %3071 = vmatpush1.bf16.msra.mxu0 %v3070_v37  ;;  %v3076_v37 = vpack.c.bf16 %v1313_v25, %v1312_v33 }
 0x473   : > { %3073 = vmatprep.subr.bf16.mxu0 %v3072_v56  ;;  %3095 = vmatpush3.bf16.msra.mxu1 %v5021_v22  ;;  %v1320_v44 = vsel %vm1309_vm0, %v3550_v43, %v3560_v50  ;;  %v1321_v6 = vsel %vm1309_vm0, %v3551_v16, %v3561_v41  ;;  %v1316_v47 = vsel %vm1309_vm0, %v3560_v50, %v3555_v31 }
 0x474   : > { %3097 = vmatprep.subr.bf16.mxu1 %v3096_v59  ;;  %v1317_v48 = vsel %vm1309_vm0, %v3561_v41, %v3556_v24  ;;  %v3100_v35 = vpack.c.bf16 %v1321_v6, %v1320_v44 }
 0x475   : > { %v3078_v22 = vpack.c.bf16 %v1317_v48, %v1316_v47 }
 0x476   : > { %3075 = vmatpush1.bf16.msra.mxu0 %v3074_v55 }
 0x477   : > { %3077 = vmatprep.subr.bf16.mxu0 %v3076_v37  ;;  %3099 = vmatpush3.bf16.msra.mxu1 %v3096_v59 }
 0x478   : > { %3101 = vmatprep.subr.bf16.mxu1 %v3100_v35 }
 0x47a   : > { %3079 = vmatpush1.bf16.msra.mxu0 %v3078_v22 }
 0x47b   : > { %3103 = vmatpush3.bf16.msra.mxu1 %v3100_v35 }
 0x47d   : > { %2686 = vmatmul.mubr.msk.f32.vlgmr.msra.gmra.mrb[8].mxu0 %vm667_vm9, %v5026_v39 }
 0x47e   : > { %2895 = vmatmul.mubr.msk.f32.vlgmr.msra.gmra.mrb[16].mxu1 %vm667_vm9, %v1324_v32  ;;  %1434 = vmatprep.mubr.f32.mxu0 %v4017_v10  ;;  %v1335_v39 = vpop.permute.xlu1 %1334 }
 0x47f   : > { %2897 = vmatprep.mubr.msk.f32.mxu1 %vm667_vm9, %v1325_v13 }
 0x481   : > { %2687 = vmatmul.mubr.msk.f32.gmra.mrb[10].mxu0 %vm667_vm9, %v1324_v32  ;;  %v1340_v38 = vpop.permute.xlu0 %1339 }
 0x482   : > { %2898 = vmatmul.mubr.msk.f32.gmra.mrb[18].mxu1 %vm667_vm9, %v1326_v0  ;;  %1440 = vmatprep.mubr.f32.mxu0 %v4017_v10  ;;  %v1345_v4 = vpop.permute.xlu1 %1344 }
 0x485   : > { %2688 = vmatmul.mubr.msk.f32.gmra.mrb[12].mxu0 %vm667_vm9, %v1325_v13  ;;  %v1350_v16 = vpop.permute.xlu0 %1349 }
 0x486   : > { %1446 = vmatprep.mubr.f32.mxu0 %v4017_v10 }
 0x489   : > { %2689 = vmatmul.mubr.msk.f32.gmra.mrb[14].mxu0 %vm667_vm9, %v1326_v0 }
 0x48a   : > { %1764 = vmatprep.mubr.f32.mxu0 %v4017_v10 }
 0x550   : > { %v1430_v26 = vpop.f32.mrb[8].mxu0 }
 0x551   : > { %v1431_v12 = vadd.f32 %v1430_v26, %v1335_v39  ;;  %v1432_v62 = vpop.f32.mrb[9].mxu0  ;;  %v2896_v23 = vpop.f32.mrb[16].mxu1 }
 0x552   : > { %v1433_v30 = vadd.f32 %v1432_v62, %v1335_v39  ;;  %v1525_v49 = vadd.f32 %v2896_v23, %v1340_v38  ;;  %v1519_v52 = vpop.f32.mrb[17].mxu1 }
 0x553   : > { %v1538_v46 = vsel %vm4431_vm2, %v1431_v12, 0.0  ;;  %v1520_v2 = vadd.f32 %v1519_v52, %v1335_v39 }
 0x554   : > { %vm1550_vm1 = vcmp.ge.f32.partialorder %v1538_v46, 0.0  ;;  %v1562_v14 = vmul.f32 0.1, %v1538_v46  ;;  %v1539_v61 = vsel %vm4451_vm7, %v1433_v30, 0.0  ;;  %v1543_v18 = vsel %vm4473_vm12, %v1525_v49, 0.0  ;;  %v1436_v17 = vpop.f32.mrb[10].mxu0 }
 0x555   : > { %vm1551_vm3 = vcmp.ge.f32.partialorder %v1539_v61, 0.0  ;;  %v1563_v29 = vmul.f32 0.1, %v1539_v61  ;;  %vm1555_vm4 = vcmp.ge.f32.partialorder %v1543_v18, 0.0  ;;  %v1567_v36 = vmul.f32 0.1, %v1543_v18 }
 0x556   : > { %v5126_v40 = vsel %vm1550_vm1, %v1538_v46, %v1562_v14  ;;  %v1540_v53 = vsel %vm4473_vm12, %v1520_v2, 0.0  ;;  %v1437_v19 = vadd.f32 %v1436_v17, %v1340_v38  ;;  %v1438_v24 = vpop.f32.mrb[11].mxu0  ;;  %v2899_v31 = vpop.f32.mrb[18].mxu1 }
 0x557   : > { %v5130_v43 = vsel %vm1551_vm3, %v1539_v61, %v1563_v29  ;;  %v1579_v51 = vsel %vm1555_vm4, %v1543_v18, %v1567_v36  ;;  %vm1552_vm5 = vcmp.ge.f32.partialorder %v1540_v53, 0.0  ;;  %v1564_v15 = vmul.f32 0.1, %v1540_v53  ;;  %v1529_v27 = vpop.f32.mrb[19].mxu1 }
 0x558   : > { %v1541_v60 = vsel %vm4431_vm2, %v1437_v19, 0.0  ;;  %v1439_v54 = vadd.f32 %v1438_v24, %v1340_v38  ;;  %v1535_v41 = vadd.f32 %v2899_v31, %v1350_v16  ;;  %v1530_v50 = vadd.f32 %v1529_v27, %v1345_v4  ;;  %v1442_v56 = vpop.f32.mrb[12].mxu0 }
 0x559   : > { %v1576_v59 = vsel %vm1552_vm5, %v1540_v53, %v1564_v15  ;;  %vm1553_vm10 = vcmp.ge.f32.partialorder %v1541_v60, 0.0  ;;  %v1565_v33 = vmul.f32 0.1, %v1541_v60  ;;  %v1443_v25 = vadd.f32 %v1442_v56, %v1345_v4  ;;  %v1444_v44 = vpop.f32.mrb[13].mxu0  ;;  %v5194_v56 = vld [vmem:[#allocation9 + $0x20] sm:$0xff] }
 0x55a   : > { %v1542_v55 = vsel %vm4451_vm7, %v1439_v54, 0.0  ;;  %v1549_v6 = vsel %vm4473_vm12, %v1535_v41, 0.0  ;;  %v1546_v47 = vsel %vm4473_vm12, %v1530_v50, 0.0  ;;  %v1445_v48 = vadd.f32 %v1444_v44, %v1345_v4  ;;  %2924 = vmatprep.mubr.msk.f32.mxu1 %vm667_vm9, %v5194_v56 }
 0x55b   : > { %v5140_v37 = vsel %vm1553_vm10, %v1541_v60, %v1565_v33  ;;  %vm1554_vm11 = vcmp.ge.f32.partialorder %v1542_v55, 0.0  ;;  %v1566_v35 = vmul.f32 0.1, %v1542_v55  ;;  %vm1561_vm13 = vcmp.ge.f32.partialorder %v1549_v6, 0.0  ;;  %v2696_v33 = vld [vmem:[%s5810_s17 + $0x30] sm:$0xff] }
 0x55c   : > { %v3114_v22 = vpack.c.bf16 %v5140_v37, %v5126_v40  ;;  %v1573_v32 = vmul.f32 0.1, %v1549_v6  ;;  %vm1558_vm14 = vcmp.ge.f32.partialorder %v1546_v47, 0.0  ;;  %v1570_v13 = vmul.f32 0.1, %v1546_v47  ;;  %v1448_v0 = vpop.f32.mrb[14].mxu0 }
 0x55d   : > { %v5144_v39 = vsel %vm1554_vm11, %v1542_v55, %v1566_v35  ;;  %v1544_v38 = vsel %vm4431_vm2, %v1443_v25, 0.0  ;;  %v1545_v26 = vsel %vm4451_vm7, %v1445_v48, 0.0  ;;  %v3562_v12 = vpack.i.bf16 %v1579_v51, %v1576_v59  ;;  %v1450_v62 = vpop.f32.mrb[15].mxu0  ;;  %v2697_v25 = vld [vmem:[%s5810_s17 + $0x38] sm:$0xff] }
 0x55e   : > { %v1585_v23 = vsel %vm1561_vm13, %v1549_v6, %v1573_v32  ;;  %v1582_v30 = vsel %vm1558_vm14, %v1546_v47, %v1570_v13  ;;  %vm1556_vm15 = vcmp.ge.f32.partialorder %v1544_v38, 0.0  ;;  %v1568_v49 = vmul.f32 0.1, %v1544_v38 }
 0x55f   : > { %vm1557_vm0 = vcmp.ge.f32.partialorder %v1545_v26, 0.0  ;;  %v1569_v52 = vmul.f32 0.1, %v1545_v26  ;;  %3563 = vrot.lane.b32.xlu1 %v3562_v12, %s4015_s6  ;;  %v1449_v46 = vadd.f32 %v1448_v0, %v1350_v16  ;;  %v1451_v2 = vadd.f32 %v1450_v62, %v1350_v16 }
 0x560   : > { %v5151_v14 = vsel %vm1556_vm15, %v1544_v38, %v1568_v49  ;;  %v3572_v61 = vpack.i.bf16 %v5144_v39, %v5130_v43  ;;  %v3567_v18 = vpack.i.bf16 %v5140_v37, %v5126_v40  ;;  %v3587_v17 = vpack.i.bf16 %v1585_v23, %v1582_v30 }
 0x561   : > { %v5157_v4 = vsel %vm1557_vm0, %v1545_v26, %v1569_v52  ;;  %v1547_v29 = vsel %vm4431_vm2, %v1449_v46, 0.0  ;;  %v1548_v36 = vsel %vm4451_vm7, %v1451_v2, 0.0  ;;  %v3112_v24 = vpack.c.bf16 %v5144_v39, %v5130_v43 }
 0x562   : > { %vm1559_vm1 = vcmp.ge.f32.partialorder %v1547_v29, 0.0  ;;  %v1571_v53 = vmul.f32 0.1, %v1547_v29  ;;  %vm1560_vm3 = vcmp.ge.f32.partialorder %v1548_v36, 0.0  ;;  %v1572_v19 = vmul.f32 0.1, %v1548_v36  ;;  %3573 = vrot.lane.b32.xlu0 %v3572_v61, %s4015_s6 }
 0x563   : > { %3568 = vrot.lane.b32.xlu1 %v3567_v18, %s4015_s6  ;;  %v5171_v15 = vpack.c.bf16 %v1579_v51, %v1576_v59  ;;  %v5173_v27 = vpack.c.bf16 %v1585_v23, %v1582_v30  ;;  %v2694_v51 = vld [vmem:[%s5810_s17 + $0x20] sm:$0xff]  ;;  %v2695_v59 = vld [vmem:[%s5810_s17 + $0x28] sm:$0xff] }
 0x564   : > { %v5167_v31 = vsel %vm1559_vm1, %v1547_v29, %v1571_v53  ;;  %v5169_v16 = vsel %vm1560_vm3, %v1548_v36, %v1572_v19 }
 0x565   : > { %v3118_v60 = vpack.c.bf16 %v5167_v31, %v5151_v14  ;;  %v3577_v54 = vpack.i.bf16 %v5167_v31, %v5151_v14  ;;  %v3582_v41 = vpack.i.bf16 %v5169_v16, %v5157_v4  ;;  %v3116_v50 = vpack.c.bf16 %v5169_v16, %v5157_v4 }
 0x567   : > { %3578 = vrot.lane.b32.xlu0 %v3577_v54, %s4015_s6  ;;  %3583 = vrot.lane.b32.xlu1 %v3582_v41, %s4015_s6 }
 0x56b   : > { %3588 = vrot.lane.b32.xlu0 %v3587_v17, %s4015_s6  ;;  %3593 = vrot.lane.b32.xlu1 %v3572_v61, %s4016_s14 }
 0x56f   : > { %3598 = vrot.lane.b32.xlu0 %v3562_v12, %s4016_s14  ;;  %3603 = vrot.lane.b32.xlu1 %v3567_v18, %s4016_s14 }
 0x573   : > { %3613 = vrot.lane.b32.xlu0 %v3582_v41, %s4016_s14  ;;  %3608 = vrot.lane.b32.xlu1 %v3587_v17, %s4016_s14 }
 0x577   : > { %3618 = vrot.lane.b32.xlu0 %v3577_v54, %s4016_s14  ;;  %1670 = vperm.xlu1 %3441, %v2694_v51  }
 0x57b   : > { %1675 = vperm.xlu0 %3440, %v2695_v59   ;;  %1680 = vperm.xlu1 %3441, %v2696_v33  }
 0x57f   : > { %1685 = vperm.xlu0 %3440, %v2697_v25  }
 0x5d1   : > { %v3564_v44 = vpop.permute.xlu1 %3563 }
 0x5d2   : > { %v3566_v6 = vunpack.i.h.bf16 %v3564_v44  ;;  %v3565_v47 = vunpack.i.l.bf16 %v3564_v44 }
 0x5d4   : > { %v3574_v55 = vpop.permute.xlu0 %3573 }
 0x5d5   : > { %v3576_v48 = vunpack.i.h.bf16 %v3574_v55  ;;  %v3575_v35 = vunpack.i.l.bf16 %v3574_v55  ;;  %v3569_v32 = vpop.permute.xlu1 %3568 }
 0x5d6   : > { %v3571_v13 = vunpack.i.h.bf16 %v3569_v32  ;;  %v3570_v0 = vunpack.i.l.bf16 %v3569_v32 }
 0x5d7   : > { %v1610_v38 = vsel %vm589_vm6, %v3575_v35, %v3565_v47  ;;  %v1611_v26 = vsel %vm589_vm6, %v3576_v48, %v3566_v6 }
 0x5d8   : > { %v1619_v12 = vsel %vm589_vm6, %v3566_v6, %v3571_v13  ;;  %v1618_v62 = vsel %vm589_vm6, %v3565_v47, %v3570_v0  ;;  %v3128_v23 = vpack.c.bf16 %v1611_v26, %v1610_v38  ;;  %v1614_v30 = vsel %vm589_vm6, %v3570_v0, %v3575_v35 }
 0x5d9   : > { %v3106_v49 = vpack.c.bf16 %v1619_v12, %v1618_v62  ;;  %v3579_v52 = vpop.permute.xlu0 %3578  ;;  %v1615_v46 = vsel %vm589_vm6, %v3571_v13, %v3576_v48  ;;  %v3584_v2 = vpop.permute.xlu1 %3583 }
 0x5da   : > { %3129 = vmatprep.subr.bf16.mxu1 %v3128_v23  ;;  %v3581_v61 = vunpack.i.h.bf16 %v3579_v52  ;;  %v3580_v18 = vunpack.i.l.bf16 %v3579_v52  ;;  %v3104_v17 = vpack.c.bf16 %v1615_v46, %v1614_v30  ;;  %v3586_v29 = vunpack.i.h.bf16 %v3584_v2 }
 0x5db   : > { %3131 = vmatpush3.bf16.msra.mxu1 %v3128_v23  ;;  %v3585_v36 = vunpack.i.l.bf16 %v3584_v2 }
 0x5dc   : > { %3105 = vmatprep.subr.bf16.mxu0 %v3104_v17  ;;  %v1617_v53 = vsel %vm589_vm6, %v3581_v61, %v3586_v29 }
 0x5dd   : > { %3107 = vmatpush1.bf16.msra.mxu0 %v3106_v49  ;;  %v3589_v19 = vpop.permute.xlu0 %3588  ;;  %v3594_v54 = vpop.permute.xlu1 %3593  ;;  %v1616_v41 = vsel %vm589_vm6, %v3580_v18, %v3585_v36 }
 0x5de   : > { %v3591_v51 = vunpack.i.h.bf16 %v3589_v19  ;;  %v3590_v59 = vunpack.i.l.bf16 %v3589_v19  ;;  %v3108_v33 = vpack.c.bf16 %v1617_v53, %v1616_v41  ;;  %v3596_v38 = vunpack.i.h.bf16 %v3594_v54  ;;  %v1661_v41 = vld [vmem:[#allocation9 + $0x30] sm:$0xff] }
 0x5df   : > { %v3595_v26 = vunpack.i.l.bf16 %v3594_v54  ;;  %v1660_v54 = vld [vmem:[#allocation9 + $0x28] sm:$0xff] }
 0x5e0   : > { %v1620_v25 = vsel %vm589_vm6, %v3590_v59, %v3580_v18  ;;  %v1621_v44 = vsel %vm589_vm6, %v3591_v51, %v3581_v61  ;;  %v1612_v55 = vsel %vm589_vm6, %v3585_v36, %v3590_v59  ;;  %v1613_v6 = vsel %vm589_vm6, %v3586_v29, %v3591_v51  ;;  %3109 = vmatprep.subr.bf16.mxu0 %v3108_v33  ;;  %v1662_v51 = vld [vmem:[#allocation9 + $0x38] sm:$0xff] }
 0x5e1   : > { %v3110_v47 = vpack.c.bf16 %v1621_v44, %v1620_v25  ;;  %v3599_v48 = vpop.permute.xlu0 %3598  ;;  %v3604_v35 = vpop.permute.xlu1 %3603  ;;  %v3132_v32 = vpack.c.bf16 %v1613_v6, %v1612_v55 }
 0x5e2   : > { %v3601_v13 = vunpack.i.h.bf16 %v3599_v48  ;;  %v3600_v0 = vunpack.i.l.bf16 %v3599_v48  ;;  %v3606_v12 = vunpack.i.h.bf16 %v3604_v35  ;;  %v3605_v62 = vunpack.i.l.bf16 %v3604_v35 }
 0x5e3   : > { %3111 = vmatpush1.bf16.msra.mxu0 %v3110_v47  ;;  %3133 = vmatprep.subr.bf16.mxu1 %v3132_v32 }
 0x5e4   : > { %3113 = vmatprep.subr.bf16.mxu0 %v3112_v24  ;;  %3135 = vmatpush3.bf16.msra.mxu1 %v3132_v32  ;;  %v1646_v49 = vsel %vm626_vm8, %v3595_v26, %v3600_v0  ;;  %v1647_v52 = vsel %vm626_vm8, %v3596_v38, %v3601_v13  ;;  %v1654_v43 = vsel %vm626_vm8, %v3600_v0, %v3605_v62 }
 0x5e5   : > { %v3614_v23 = vpop.permute.xlu0 %3613  ;;  %3137 = vmatprep.subr.bf16.mxu1 %v5171_v15  ;;  %v3609_v30 = vpop.permute.xlu1 %3608  ;;  %v1655_v39 = vsel %vm626_vm8, %v3601_v13, %v3606_v12  ;;  %v1650_v24 = vsel %vm626_vm8, %v3605_v62, %v3595_v26  ;;  %v1651_v40 = vsel %vm626_vm8, %v3606_v12, %v3596_v38  ;;  %v3120_v4 = vpack.c.bf16 %v1647_v52, %v1646_v49 }
 0x5e6   : > { %v3616_v46 = vunpack.i.h.bf16 %v3614_v23  ;;  %v3615_v2 = vunpack.i.l.bf16 %v3614_v23  ;;  %v3611_v61 = vunpack.i.h.bf16 %v3609_v30  ;;  %v3610_v18 = vunpack.i.l.bf16 %v3609_v30 }
 0x5e7   : > { %3115 = vmatpush1.bf16.msra.mxu0 %v3114_v22  ;;  %v3144_v16 = vpack.c.bf16 %v1655_v39, %v1654_v43  ;;  %v3122_v36 = vpack.c.bf16 %v1651_v40, %v1650_v24 }
 0x5e8   : > { %3117 = vmatprep.subr.bf16.mxu0 %v3116_v50  ;;  %3139 = vmatpush3.bf16.msra.mxu1 %v5171_v15  ;;  %v1648_v15 = vsel %vm626_vm8, %v3615_v2, %v3610_v18  ;;  %v1649_v50 = vsel %vm626_vm8, %v3616_v46, %v3611_v61 }
 0x5e9   : > { %v3619_v17 = vpop.permute.xlu0 %3618  ;;  %3141 = vmatprep.subr.bf16.mxu1 %v5173_v27 }
 0x5ea   : > { %v3621_v37 = vunpack.i.h.bf16 %v3619_v17  ;;  %v3620_v22 = vunpack.i.l.bf16 %v3619_v17 }
 0x5eb   : > { %3119 = vmatpush1.bf16.msra.mxu0 %v3118_v60  ;;  %v3124_v60 = vpack.c.bf16 %v1649_v50, %v1648_v15 }
 0x5ec   : > { %3121 = vmatprep.subr.bf16.mxu0 %v3120_v4  ;;  %3143 = vmatpush3.bf16.msra.mxu1 %v5173_v27  ;;  %v1656_v29 = vsel %vm626_vm8, %v3610_v18, %v3620_v22  ;;  %v1657_v53 = vsel %vm626_vm8, %v3611_v61, %v3621_v37  ;;  %v1652_v14 = vsel %vm626_vm8, %v3620_v22, %v3615_v2 }
 0x5ed   : > { %3145 = vmatprep.subr.bf16.mxu1 %v3144_v16  ;;  %v1653_v31 = vsel %vm626_vm8, %v3621_v37, %v3616_v46  ;;  %v3148_v19 = vpack.c.bf16 %v1657_v53, %v1656_v29 }
 0x5ee   : > { %v3126_v27 = vpack.c.bf16 %v1653_v31, %v1652_v14 }
 0x5ef   : > { %3123 = vmatpush1.bf16.msra.mxu0 %v3122_v36 }
 0x5f0   : > { %3125 = vmatprep.subr.bf16.mxu0 %v3124_v60  ;;  %3147 = vmatpush3.bf16.msra.mxu1 %v3144_v16 }
 0x5f1   : > { %3149 = vmatprep.subr.bf16.mxu1 %v3148_v19 }
 0x5f3   : > { %3127 = vmatpush1.bf16.msra.mxu0 %v3126_v27 }
 0x5f4   : > { %3151 = vmatpush3.bf16.msra.mxu1 %v3148_v19 }
 0x5f6   : > { %2698 = vmatmul.mubr.msk.f32.vlgmr.msra.gmra.mrb[16].mxu0 %vm667_vm9, %v5194_v56  ;;  %v1671_v56 = vpop.permute.xlu1 %1670 }
 0x5f7   : > { %2925 = vmatmul.mubr.msk.f32.vlgmr.msra.gmra.mrb[20].mxu1 %vm667_vm9, %v1660_v54  ;;  %1770 = vmatprep.mubr.f32.mxu0 %v4017_v10 }
 0x5f8   : > { %2927 = vmatprep.mubr.msk.f32.mxu1 %vm667_vm9, %v1661_v41 }
 0x5fa   : > { %2699 = vmatmul.mubr.msk.f32.gmra.mrb[18].mxu0 %vm667_vm9, %v1660_v54  ;;  %v1676_v59 = vpop.permute.xlu0 %1675  ;;  %v1681_v39 = vpop.permute.xlu1 %1680 }
 0x5fb   : > { %2928 = vmatmul.mubr.msk.f32.gmra.mrb[22].mxu1 %vm667_vm9, %v1662_v51  ;;  %1776 = vmatprep.mubr.f32.mxu0 %v4017_v10 }
 0x5fe   : > { %2700 = vmatmul.mubr.msk.f32.gmra.mrb[20].mxu0 %vm667_vm9, %v1661_v41 }
 0x5ff   : > { %1782 = vmatprep.mubr.f32.mxu0 %v4017_v10 }
 0x602   : > { %2701 = vmatmul.mubr.msk.f32.gmra.mrb[22].mxu0 %vm667_vm9, %v1662_v51 }
 0x603   : > { %2114 = vmatprep.mubr.f32.mxu0 %v4017_v10 }
 0x6c9   : > { %v1766_v33 = vpop.f32.mrb[16].mxu0 }
 0x6ca   : > { %v1767_v25 = vadd.f32 %v1766_v33, %v1671_v56  ;;  %v1768_v44 = vpop.f32.mrb[17].mxu0  ;;  %v2926_v55 = vpop.f32.mrb[20].mxu1 }
 0x6cb   : > { %v1769_v6 = vadd.f32 %v1768_v44, %v1671_v56  ;;  %v1861_v47 = vadd.f32 %v2926_v55, %v1676_v59  ;;  %v1855_v48 = vpop.f32.mrb[21].mxu1 }
 0x6cc   : > { %v1874_v35 = vsel %vm4431_vm2, %v1767_v25, 0.0  ;;  %v1856_v32 = vadd.f32 %v1855_v48, %v1671_v56 }
 0x6cd   : > { %v5287_v13 = vadd.f32 %v1874_v35, %v4899_v1  ;;  %v1875_v0 = vsel %vm4451_vm7, %v1769_v6, 0.0  ;;  %v1879_v38 = vsel %vm4473_vm12, %v1861_v47, 0.0  ;;  %v1772_v26 = vpop.f32.mrb[18].mxu0  ;;  %v1686_v1 = vpop.permute.xlu0 %1685 }
 0x6ce   : > { %v5294_v12 = vadd.f32 %v1875_v0, %v4902_v3  ;;  %v1891_v62 = vadd.f32 %v1879_v38, %v4889_v45  ;;  %v1876_v23 = vsel %vm4473_vm12, %v1856_v32, 0.0  ;;  %v1773_v30 = vadd.f32 %v1772_v26, %v1676_v59  ;;  %v1774_v49 = vpop.f32.mrb[19].mxu0  ;;  %v2929_v52 = vpop.f32.mrb[22].mxu1 }
 0x6cf   : > { %vm1898_vm4 = vcmp.ge.f32.partialorder %v5287_v13, 0.0  ;;  %v1910_v46 = vmul.f32 0.1, %v5287_v13  ;;  %v1888_v2 = vadd.f32 %v1876_v23, %v4896_v58  ;;  %v1775_v61 = vadd.f32 %v1774_v49, %v1676_v59  ;;  %v1865_v18 = vpop.f32.mrb[23].mxu1 }
 0x6d0   : > { %vm1903_vm5 = vcmp.ge.f32.partialorder %v1891_v62, 0.0  ;;  %v1915_v3 = vmul.f32 0.1, %v1891_v62  ;;  %v1877_v45 = vsel %vm4431_vm2, %v1773_v30, 0.0  ;;  %v1871_v43 = vadd.f32 %v2929_v52, %v1686_v1 }
 0x6d1   : > { %vm1900_vm10 = vcmp.ge.f32.partialorder %v1888_v2, 0.0  ;;  %v1912_v24 = vmul.f32 0.1, %v1888_v2  ;;  %v1889_v17 = vadd.f32 %v1877_v45, %v4915_v63  ;;  %v1878_v40 = vsel %vm4451_vm7, %v1775_v61, 0.0  ;;  %v1778_v37 = vpop.f32.mrb[20].mxu0 }
 0x6d2   : > { %v5308_v22 = vadd.f32 %v1878_v40, %v4924_v34  ;;  %v1885_v58 = vsel %vm4473_vm12, %v1871_v43, 0.0  ;;  %v1866_v4 = vadd.f32 %v1865_v18, %v1681_v39  ;;  %v1779_v16 = vadd.f32 %v1778_v37, %v1681_v39  ;;  %v1780_v15 = vpop.f32.mrb[21].mxu0  ;;  %v2708_v40 = vld [vmem:[%s5808_s23 + $0x50] sm:$0xff]  ;;  %v2707_v37 = vld [vmem:[%s5808_s23 + $0x48] sm:$0xff] }
 0x6d3   : > { %vm1901_vm11 = vcmp.ge.f32.partialorder %v1889_v17, 0.0  ;;  %v1913_v50 = vmul.f32 0.1, %v1889_v17  ;;  %v1897_v29 = vadd.f32 %v1885_v58, %v4953_v7  ;;  %v1781_v36 = vadd.f32 %v1780_v15, %v1681_v39  ;;  %v2709_v58 = vld [vmem:[%s5808_s23 + $0x58] sm:$0xff] }
 0x6d4   : > { %v1882_v63 = vsel %vm4473_vm12, %v1866_v4, 0.0  ;;  %v1880_v53 = vsel %vm4431_vm2, %v1779_v16, 0.0  ;;  %v1924_v34 = vsel %vm1900_vm10, %v1888_v2, %v1912_v24  ;;  %v1927_v14 = vsel %vm1903_vm5, %v1891_v62, %v1915_v3  ;;  %v2706_v24 = vld [vmem:[%s5808_s23 + $0x40] sm:$0xff] }
 0x6d5   : > { %vm1909_vm13 = vcmp.ge.f32.partialorder %v1897_v29, 0.0  ;;  %v1921_v31 = vmul.f32 0.1, %v1897_v29  ;;  %v1894_v60 = vadd.f32 %v1882_v63, %v4920_v8  ;;  %v1892_v19 = vadd.f32 %v1880_v53, %v4936_v9  ;;  %v1784_v27 = vpop.f32.mrb[22].mxu0 }
 0x6d6   : > { %v1881_v7 = vsel %vm4451_vm7, %v1781_v36, 0.0  ;;  %v1785_v54 = vadd.f32 %v1784_v27, %v1686_v1  ;;  %v3622_v41 = vpack.i.bf16 %v1927_v14, %v1924_v34  ;;  %v1786_v51 = vpop.f32.mrb[23].mxu0  ;;  %vm1899_vm14 = vcmp.ge.f32.partialorder %v5294_v12, 0.0 }
 0x6d7   : > { %vm1906_vm15 = vcmp.ge.f32.partialorder %v1894_v60, 0.0  ;;  %v1918_v56 = vmul.f32 0.1, %v1894_v60  ;;  %vm1904_vm0 = vcmp.ge.f32.partialorder %v1892_v19, 0.0  ;;  %v1916_v59 = vmul.f32 0.1, %v1892_v19 }
 0x6d8   : > { %v5325_v33 = vadd.f32 %v1881_v7, %v4946_v20  ;;  %v1883_v8 = vsel %vm4431_vm2, %v1785_v54, 0.0  ;;  %3623 = vrot.lane.b32.xlu1 %v3622_v41, %s4021_s30  ;;  %v1787_v9 = vadd.f32 %v1786_v51, %v1686_v1  ;;  %vm1902_vm1 = vcmp.ge.f32.partialorder %v5308_v22, 0.0 }
 0x6d9   : > { %v1895_v25 = vadd.f32 %v1883_v8, %v4971_v57  ;;  %v1911_v44 = vmul.f32 0.1, %v5294_v12  ;;  %v1914_v55 = vmul.f32 0.1, %v5308_v22  ;;  %v5337_v20 = vsel %vm1898_vm4, %v5287_v13, %v1910_v46 }
 0x6da   : > { %v1884_v6 = vsel %vm4451_vm7, %v1787_v9, 0.0  ;;  %v5342_v47 = vsel %vm1901_vm11, %v1889_v17, %v1913_v50  ;;  %v5344_v48 = vsel %vm1904_vm0, %v1892_v19, %v1916_v59  ;;  %vm1905_vm3 = vcmp.ge.f32.partialorder %v5325_v33, 0.0  ;;  %v5399_v17 = vld [vmem:[#allocation8 + $0x40] sm:$0xff] }
 0x6db   : > { %vm1907_vm5 = vcmp.ge.f32.partialorder %v1895_v25, 0.0  ;;  %v1919_v57 = vmul.f32 0.1, %v1895_v25  ;;  %v5348_v35 = vadd.f32 %v1884_v6, %v4980_v42  ;;  %v5353_v32 = vsel %vm1899_vm14, %v5294_v12, %v1911_v44  ;;  %2954 = vmatprep.mubr.msk.f32.mxu1 %vm667_vm9, %v5399_v17 }
 0x6dc   : > { %v5356_v13 = vsel %vm1902_vm1, %v5308_v22, %v1914_v55  ;;  %v3627_v0 = vpack.i.bf16 %v5342_v47, %v5337_v20  ;;  %v1917_v38 = vmul.f32 0.1, %v5325_v33  ;;  %v1930_v26 = vsel %vm1906_vm15, %v1894_v60, %v1918_v56 }
 0x6dd   : > { %v3632_v62 = vpack.i.bf16 %v5356_v13, %v5353_v32  ;;  %v5364_v42 = vsel %vm1907_vm5, %v1895_v25, %v1919_v57  ;;  %vm1908_vm4 = vcmp.ge.f32.partialorder %v5348_v35, 0.0  ;;  %v1920_v23 = vmul.f32 0.1, %v5348_v35 }
 0x6de   : > { %3628 = vrot.lane.b32.xlu1 %v3627_v0, %s4021_s30  ;;  %v3637_v30 = vpack.i.bf16 %v5364_v42, %v5344_v48  ;;  %v5372_v49 = vsel %vm1905_vm3, %v5325_v33, %v1917_v38  ;;  %v1933_v52 = vsel %vm1909_vm13, %v1897_v29, %v1921_v31  ;;  %v3160_v61 = vpack.c.bf16 %v5356_v13, %v5353_v32 }
 0x6df   : > { %3633 = vrot.lane.b32.xlu0 %v3632_v62, %s4021_s30  ;;  %v5377_v1 = vsel %vm1908_vm4, %v5348_v35, %v1920_v23  ;;  %v3647_v46 = vpack.i.bf16 %v1933_v52, %v1930_v26  ;;  %v5383_v18 = vpack.c.bf16 %v1927_v14, %v1924_v34  ;;  %v3162_v3 = vpack.c.bf16 %v5342_v47, %v5337_v20 }
 0x6e0   : > { %v3642_v2 = vpack.i.bf16 %v5377_v1, %v5372_v49  ;;  %v3164_v45 = vpack.c.bf16 %v5377_v1, %v5372_v49  ;;  %v5390_v43 = vpack.c.bf16 %v1933_v52, %v1930_v26  ;;  %v3166_v39 = vpack.c.bf16 %v5364_v42, %v5344_v48 }
 0x6e1   : > { %vm1958_vm10 = vcmp.lt.s32.totalorder %v4426_v5, 5  ;;  %vm1995_vm11 = vcmp.lt.s32.totalorder %v4426_v5, 123  ;;  %v2340_v5 = vld [vmem:[#allocation9 + $0x58] sm:$0xff] }
 0x6e2   : > { %3643 = vrot.lane.b32.xlu1 %v3642_v2, %s4021_s30 }
 0x6e3   : > { %3638 = vrot.lane.b32.xlu0 %v3637_v30, %s4021_s30 }
 0x6e6   : > { %3653 = vrot.lane.b32.xlu1 %v3632_v62, %s4022_s24 }
 0x6e7   : > { %3648 = vrot.lane.b32.xlu0 %v3647_v46, %s4021_s30  ;;  %s3854_s30 = scalar_lea.vmem %s5636_s25, 512 }
 0x6e8   : > { %p3855_p6 = scmp.ne.s32.totalorder %s5636_s25, %s3854_s30 }
 0x6ea   : > { %3663 = vrot.lane.b32.xlu1 %v3627_v0, %s4022_s24  ;;  %p3856_p11 = pnand %p3855_p6, %p5814_p12 }
 0x6eb   : > { %3658 = vrot.lane.b32.xlu0 %v3622_v41, %s4022_s24 }
 0x6ec   : > { %p3857_p4 = pneg %p3856_p11 }
 0x6ee   : > { %3668 = vrot.lane.b32.xlu1 %v3647_v46, %s4022_s24 }
 0x6ef   : > { %3673 = vrot.lane.b32.xlu0 %v3642_v2, %s4022_s24 }
 0x6f2   : > { %2020 = vperm.xlu1 %3441, %v2706_v24  }
 0x6f3   : > { %3678 = vrot.lane.b32.xlu0 %v3637_v30, %s4022_s24 }
 0x6f6   : > { %2030 = vperm.xlu1 %3441, %v2708_v40  }
 0x6f7   : > { %2025 = vperm.xlu0 %3440, %v2707_v37  }
 0x6fb   : > { %2035 = vperm.xlu0 %3440, %v2709_v58  }
 0x74a   : > { %v3624_v4 = vpop.permute.xlu1 %3623 }
 0x74b   : > { %v3626_v15 = vunpack.i.h.bf16 %v3624_v4  ;;  %v3625_v50 = vunpack.i.l.bf16 %v3624_v4 }
 0x750   : > { %v3629_v16 = vpop.permute.xlu1 %3628 }
 0x751   : > { %v3634_v29 = vpop.permute.xlu0 %3633  ;;  %v3631_v36 = vunpack.i.h.bf16 %v3629_v16  ;;  %v3630_v63 = vunpack.i.l.bf16 %v3629_v16 }
 0x752   : > { %v3636_v53 = vunpack.i.h.bf16 %v3634_v29  ;;  %v3635_v34 = vunpack.i.l.bf16 %v3634_v29 }
 0x753   : > { %v1968_v14 = vsel %vm1958_vm10, %v3626_v15, %v3631_v36  ;;  %v1967_v31 = vsel %vm1958_vm10, %v3625_v50, %v3630_v63 }
 0x754   : > { %v3154_v60 = vpack.c.bf16 %v1968_v14, %v1967_v31  ;;  %v1959_v19 = vsel %vm1958_vm10, %v3635_v34, %v3625_v50  ;;  %v1960_v27 = vsel %vm1958_vm10, %v3636_v53, %v3626_v15  ;;  %v1963_v7 = vsel %vm1958_vm10, %v3630_v63, %v3635_v34  ;;  %v3644_v54 = vpop.permute.xlu1 %3643 }
 0x755   : > { %v3176_v41 = vpack.c.bf16 %v1960_v27, %v1959_v19  ;;  %v3639_v51 = vpop.permute.xlu0 %3638  ;;  %v1964_v56 = vsel %vm1958_vm10, %v3631_v36, %v3636_v53  ;;  %v3646_v59 = vunpack.i.h.bf16 %v3644_v54  ;;  %v3645_v8 = vunpack.i.l.bf16 %v3644_v54 }
 0x756   : > { %v3641_v9 = vunpack.i.h.bf16 %v3639_v51  ;;  %v3640_v25 = vunpack.i.l.bf16 %v3639_v51  ;;  %v3152_v44 = vpack.c.bf16 %v1964_v56, %v1963_v7  ;;  %v2010_v56 = vld [vmem:[#allocation8 + $0x48] sm:$0xff] }
 0x757   : > { %3177 = vmatprep.subr.bf16.mxu1 %v3176_v41 }
 0x758   : > { %3153 = vmatprep.subr.bf16.mxu0 %v3152_v44  ;;  %3179 = vmatpush3.bf16.msra.mxu1 %v3176_v41  ;;  %v3654_v55 = vpop.permute.xlu1 %3653  ;;  %v1965_v6 = vsel %vm1958_vm10, %v3640_v25, %v3645_v8  ;;  %v1966_v57 = vsel %vm1958_vm10, %v3641_v9, %v3646_v59 }
 0x759   : > { %3155 = vmatpush1.bf16.msra.mxu0 %v3154_v60  ;;  %v3649_v0 = vpop.permute.xlu0 %3648  ;;  %v3156_v38 = vpack.c.bf16 %v1966_v57, %v1965_v6  ;;  %v3656_v16 = vunpack.i.h.bf16 %v3654_v55  ;;  %v3655_v15 = vunpack.i.l.bf16 %v3654_v55 }
 0x75a   : > { %v3651_v26 = vunpack.i.h.bf16 %v3649_v0  ;;  %v3650_v62 = vunpack.i.l.bf16 %v3649_v0 }
 0x75b   : > { %3157 = vmatprep.subr.bf16.mxu0 %v3156_v38 }
 0x75c   : > { %v1969_v23 = vsel %vm1958_vm10, %v3650_v62, %v3640_v25  ;;  %v1970_v30 = vsel %vm1958_vm10, %v3651_v26, %v3641_v9  ;;  %v3664_v52 = vpop.permute.xlu1 %3663  ;;  %v1961_v46 = vsel %vm1958_vm10, %v3645_v8, %v3650_v62  ;;  %v1962_v2 = vsel %vm1958_vm10, %v3646_v59, %v3651_v26  ;;  %v2011_v59 = vld [vmem:[#allocation8 + $0x50] sm:$0xff]  ;;  %v2012_v8 = vld [vmem:[#allocation8 + $0x58] sm:$0xff] }
 0x75d   : > { %v3158_v24 = vpack.c.bf16 %v1970_v30, %v1969_v23  ;;  %v3659_v40 = vpop.permute.xlu0 %3658  ;;  %v3180_v37 = vpack.c.bf16 %v1962_v2, %v1961_v46  ;;  %v3666_v50 = vunpack.i.h.bf16 %v3664_v52  ;;  %v3665_v29 = vunpack.i.l.bf16 %v3664_v52 }
 0x75e   : > { %v3661_v58 = vunpack.i.h.bf16 %v3659_v40  ;;  %v3660_v4 = vunpack.i.l.bf16 %v3659_v40 }
 0x75f   : > { %3159 = vmatpush1.bf16.msra.mxu0 %v3158_v24  ;;  %3181 = vmatprep.subr.bf16.mxu1 %v3180_v37  ;;  %v2001_v20 = vsel %vm1995_vm11, %v3666_v50, %v3656_v16 }
 0x760   : > { %3161 = vmatprep.subr.bf16.mxu0 %v3160_v61  ;;  %3183 = vmatpush3.bf16.msra.mxu1 %v3180_v37  ;;  %v3669_v36 = vpop.permute.xlu1 %3668  ;;  %v1996_v53 = vsel %vm1995_vm11, %v3655_v15, %v3660_v4  ;;  %v1997_v34 = vsel %vm1995_vm11, %v3656_v16, %v3661_v58  ;;  %v2004_v32 = vsel %vm1995_vm11, %v3660_v4, %v3665_v29 }
 0x761   : > { %v3674_v63 = vpop.permute.xlu0 %3673  ;;  %3185 = vmatprep.subr.bf16.mxu1 %v5383_v18  ;;  %v3671_v60 = vunpack.i.h.bf16 %v3669_v36  ;;  %v3670_v19 = vunpack.i.l.bf16 %v3669_v36  ;;  %v2005_v13 = vsel %vm1995_vm11, %v3661_v58, %v3666_v50  ;;  %v2000_v61 = vsel %vm1995_vm11, %v3665_v29, %v3655_v15 }
 0x762   : > { %v3676_v14 = vunpack.i.h.bf16 %v3674_v63  ;;  %v3675_v31 = vunpack.i.l.bf16 %v3674_v63  ;;  %v3168_v1 = vpack.c.bf16 %v1997_v34, %v1996_v53  ;;  %v3170_v54 = vpack.c.bf16 %v2001_v20, %v2000_v61 }
 0x763   : > { %3163 = vmatpush1.bf16.msra.mxu0 %v3162_v3 }
 0x764   : > { %3165 = vmatprep.subr.bf16.mxu0 %v3164_v45  ;;  %3187 = vmatpush3.bf16.msra.mxu1 %v5383_v18  ;;  %v3192_v18 = vpack.c.bf16 %v2005_v13, %v2004_v32  ;;  %v1998_v3 = vsel %vm1995_vm11, %v3675_v31, %v3670_v19  ;;  %v1999_v45 = vsel %vm1995_vm11, %v3676_v14, %v3671_v60 }
 0x765   : > { %v3679_v27 = vpop.permute.xlu0 %3678  ;;  %3189 = vmatprep.subr.bf16.mxu1 %v5390_v43 }
 0x766   : > { %v3681_v47 = vunpack.i.h.bf16 %v3679_v27  ;;  %v3680_v49 = vunpack.i.l.bf16 %v3679_v27 }
 0x767   : > { %3167 = vmatpush1.bf16.msra.mxu0 %v3166_v39  ;;  %v3172_v39 = vpack.c.bf16 %v1999_v45, %v1998_v3 }
 0x768   : > { %3169 = vmatprep.subr.bf16.mxu0 %v3168_v1  ;;  %3191 = vmatpush3.bf16.msra.mxu1 %v5390_v43  ;;  %v2006_v7 = vsel %vm1995_vm11, %v3670_v19, %v3680_v49  ;;  %v2007_v41 = vsel %vm1995_vm11, %v3671_v60, %v3681_v47  ;;  %v2002_v48 = vsel %vm1995_vm11, %v3680_v49, %v3675_v31 }
 0x769   : > { %3193 = vmatprep.subr.bf16.mxu1 %v3192_v18  ;;  %v2003_v42 = vsel %vm1995_vm11, %v3681_v47, %v3676_v14  ;;  %v3196_v51 = vpack.c.bf16 %v2007_v41, %v2006_v7 }
 0x76a   : > { %v3174_v43 = vpack.c.bf16 %v2003_v42, %v2002_v48 }
 0x76b   : > { %3171 = vmatpush1.bf16.msra.mxu0 %v3170_v54 }
 0x76c   : > { %3173 = vmatprep.subr.bf16.mxu0 %v3172_v39  ;;  %3195 = vmatpush3.bf16.msra.mxu1 %v3192_v18 }
 0x76d   : > { %3197 = vmatprep.subr.bf16.mxu1 %v3196_v51 }
 0x76f   : > { %3175 = vmatpush1.bf16.msra.mxu0 %v3174_v43 }
 0x770   : > { %3199 = vmatpush3.bf16.msra.mxu1 %v3196_v51 }
 0x772   : > { %2710 = vmatmul.mubr.msk.f32.vlgmr.msra.gmra.mrb[24].mxu0 %vm667_vm9, %v5399_v17  ;;  %v2021_v17 = vpop.permute.xlu1 %2020 }
 0x773   : > { %2955 = vmatmul.mubr.msk.f32.vlgmr.msra.gmra.mrb[24].mxu1 %vm667_vm9, %v2010_v56  ;;  %2120 = vmatprep.mubr.f32.mxu0 %v4017_v10 }
 0x774   : > { %2957 = vmatprep.mubr.msk.f32.mxu1 %vm667_vm9, %v2011_v59 }
 0x776   : > { %2711 = vmatmul.mubr.msk.f32.gmra.mrb[26].mxu0 %vm667_vm9, %v2010_v56  ;;  %v2026_v9 = vpop.permute.xlu0 %2025  ;;  %v2031_v2 = vpop.permute.xlu1 %2030 }
 0x777   : > { %2958 = vmatmul.mubr.msk.f32.gmra.mrb[26].mxu1 %vm667_vm9, %v2012_v8  ;;  %2126 = vmatprep.mubr.f32.mxu0 %v4017_v10 }
 0x77a   : > { %2712 = vmatmul.mubr.msk.f32.gmra.mrb[28].mxu0 %vm667_vm9, %v2011_v59  ;;  %v2036_v15 = vpop.permute.xlu0 %2035 }
 0x77b   : > { %2132 = vmatprep.mubr.f32.mxu0 %v4017_v10 }
 0x77e   : > { %2713 = vmatmul.mubr.msk.f32.gmra.mrb[30].mxu0 %vm667_vm9, %v2012_v8 }
 0x77f   : > { %2442 = vmatprep.mubr.f32.mxu0 %v4017_v10 }
 0x845   : > { %v2116_v25 = vpop.f32.mrb[24].mxu0 }
 0x846   : > { %v2117_v44 = vadd.f32 %v2116_v25, %v2021_v17  ;;  %v2118_v55 = vpop.f32.mrb[25].mxu0  ;;  %v2956_v6 = vpop.f32.mrb[24].mxu1 }
 0x847   : > { %v2119_v57 = vadd.f32 %v2118_v55, %v2021_v17  ;;  %v2211_v0 = vadd.f32 %v2956_v6, %v2026_v9  ;;  %v2205_v38 = vpop.f32.mrb[25].mxu1 }
 0x848   : > { %v2224_v26 = vsel %vm4431_vm2, %v2117_v44, 0.0  ;;  %v2206_v62 = vadd.f32 %v2205_v38, %v2021_v17 }
 0x849   : > { %vm2236_vm13 = vcmp.ge.f32.partialorder %v2224_v26, 0.0  ;;  %v2248_v23 = vmul.f32 0.1, %v2224_v26  ;;  %v2225_v30 = vsel %vm4451_vm7, %v2119_v57, 0.0  ;;  %v2229_v52 = vsel %vm4473_vm12, %v2211_v0, 0.0  ;;  %v2122_v46 = vpop.f32.mrb[26].mxu0 }
 0x84a   : > { %vm2241_vm14 = vcmp.ge.f32.partialorder %v2229_v52, 0.0  ;;  %v2253_v24 = vmul.f32 0.1, %v2229_v52  ;;  %vm2237_vm15 = vcmp.ge.f32.partialorder %v2225_v30, 0.0  ;;  %v2249_v40 = vmul.f32 0.1, %v2225_v30 }
 0x84b   : > { %v2226_v37 = vsel %vm4473_vm12, %v2206_v62, 0.0  ;;  %v2123_v58 = vadd.f32 %v2122_v46, %v2026_v9  ;;  %v2124_v4 = vpop.f32.mrb[27].mxu0  ;;  %v2959_v16 = vpop.f32.mrb[26].mxu1  ;;  %v5498_v50 = vsel %vm2236_vm13, %v2224_v26, %v2248_v23 }
 0x84c   : > { %v2265_v29 = vsel %vm2241_vm14, %v2229_v52, %v2253_v24  ;;  %vm2238_vm0 = vcmp.ge.f32.partialorder %v2226_v37, 0.0  ;;  %v2250_v36 = vmul.f32 0.1, %v2226_v37  ;;  %v2215_v63 = vpop.f32.mrb[27].mxu1  ;;  %v2125_v34 = vadd.f32 %v2124_v4, %v2026_v9  ;;  %v2721_v4 = vld [vmem:[%s5810_s17 + $0x58] sm:$0xff] }
 0x84d   : > { %v2227_v53 = vsel %vm4431_vm2, %v2123_v58, 0.0  ;;  %v2221_v14 = vadd.f32 %v2959_v16, %v2036_v15  ;;  %v2216_v31 = vadd.f32 %v2215_v63, %v2031_v2  ;;  %v2128_v60 = vpop.f32.mrb[28].mxu0  ;;  %v5519_v51 = vsel %vm2237_vm15, %v2225_v30, %v2249_v40  ;;  %v2718_v40 = vld [vmem:[%s5810_s17 + $0x40] sm:$0xff]  ;;  %v2720_v58 = vld [vmem:[%s5810_s17 + $0x50] sm:$0xff] }
 0x84e   : > { %v2262_v19 = vsel %vm2238_vm0, %v2226_v37, %v2250_v36  ;;  %vm2239_vm1 = vcmp.ge.f32.partialorder %v2227_v53, 0.0  ;;  %v2251_v32 = vmul.f32 0.1, %v2227_v53  ;;  %v2129_v13 = vadd.f32 %v2128_v60, %v2031_v2  ;;  %v2130_v61 = vpop.f32.mrb[29].mxu0  ;;  %v2719_v37 = vld [vmem:[%s5810_s17 + $0x48] sm:$0xff] }
 0x84f   : > { %v2228_v27 = vsel %vm4451_vm7, %v2125_v34, 0.0  ;;  %v2235_v20 = vsel %vm4473_vm12, %v2221_v14, 0.0  ;;  %v2232_v47 = vsel %vm4473_vm12, %v2216_v31, 0.0  ;;  %v2131_v49 = vadd.f32 %v2130_v61, %v2031_v2 }
 0x850   : > { %v5508_v1 = vsel %vm2239_vm1, %v2227_v53, %v2251_v32  ;;  %vm2240_vm3 = vcmp.ge.f32.partialorder %v2228_v27, 0.0  ;;  %v2252_v18 = vmul.f32 0.1, %v2228_v27  ;;  %vm2247_vm5 = vcmp.ge.f32.partialorder %v2235_v20, 0.0 }
 0x851   : > { %v3210_v3 = vpack.c.bf16 %v5508_v1, %v5498_v50  ;;  %v2259_v45 = vmul.f32 0.1, %v2235_v20  ;;  %vm2244_vm4 = vcmp.ge.f32.partialorder %v2232_v47, 0.0  ;;  %v2256_v7 = vmul.f32 0.1, %v2232_v47  ;;  %v2134_v54 = vpop.f32.mrb[30].mxu0 }
 0x852   : > { %v5512_v41 = vsel %vm2240_vm3, %v2228_v27, %v2252_v18  ;;  %v2230_v48 = vsel %vm4431_vm2, %v2129_v13, 0.0  ;;  %v2231_v28 = vsel %vm4451_vm7, %v2131_v49, 0.0  ;;  %v3682_v42 = vpack.i.bf16 %v2265_v29, %v2262_v19  ;;  %v2136_v39 = vpop.f32.mrb[31].mxu0 }
 0x853   : > { %v2271_v43 = vsel %vm2247_vm5, %v2235_v20, %v2259_v45  ;;  %v2268_v56 = vsel %vm2244_vm4, %v2232_v47, %v2256_v7  ;;  %vm2242_vm12 = vcmp.ge.f32.partialorder %v2230_v48, 0.0  ;;  %v2254_v59 = vmul.f32 0.1, %v2230_v48 }
 0x854   : > { %3683 = vrot.lane.b32.xlu1 %v3682_v42, %s4015_s6  ;;  %v2135_v8 = vadd.f32 %v2134_v54, %v2036_v15  ;;  %v2137_v17 = vadd.f32 %v2136_v39, %v2036_v15  ;;  %v2255_v9 = vmul.f32 0.1, %v2231_v28  ;;  %v3692_v25 = vpack.i.bf16 %v5512_v41, %v5519_v51 }
 0x855   : > { %v3687_v44 = vpack.i.bf16 %v5508_v1, %v5498_v50  ;;  %v3707_v55 = vpack.i.bf16 %v2271_v43, %v2268_v56  ;;  %vm2243_vm10 = vcmp.ge.f32.partialorder %v2231_v28, 0.0  ;;  %v3208_v26 = vpack.c.bf16 %v5512_v41, %v5519_v51 }
 0x856   : > { %v2233_v6 = vsel %vm4431_vm2, %v2135_v8, 0.0  ;;  %v2234_v57 = vsel %vm4451_vm7, %v2137_v17, 0.0  ;;  %3693 = vrot.lane.b32.xlu0 %v3692_v25, %s4015_s6  ;;  %v5535_v62 = vsel %vm2242_vm12, %v2230_v48, %v2254_v59  ;;  %v5537_v23 = vsel %vm2243_vm10, %v2231_v28, %v2255_v9 }
 0x857   : > { %vm2245_vm11 = vcmp.ge.f32.partialorder %v2233_v6, 0.0  ;;  %v2257_v0 = vmul.f32 0.1, %v2233_v6  ;;  %vm2246_vm13 = vcmp.ge.f32.partialorder %v2234_v57, 0.0  ;;  %v2258_v38 = vmul.f32 0.1, %v2234_v57 }
 0x858   : > { %3688 = vrot.lane.b32.xlu1 %v3687_v44, %s4015_s6 }
 0x859   : > { %v5539_v11 = vsel %vm2245_vm11, %v2233_v6, %v2257_v0  ;;  %v5541_v30 = vsel %vm2246_vm13, %v2234_v57, %v2258_v38 }
 0x85a   : > { %v3214_v52 = vpack.c.bf16 %v5539_v11, %v5535_v62  ;;  %v3697_v46 = vpack.i.bf16 %v5539_v11, %v5535_v62  ;;  %v3702_v2 = vpack.i.bf16 %v5541_v30, %v5537_v23  ;;  %v3212_v24 = vpack.c.bf16 %v5541_v30, %v5537_v23  ;;  %v2337_v62 = vld [vmem:[#allocation9 + $0x40] sm:$0xff]  ;;  %v2338_v11 = vld [vmem:[#allocation9 + $0x48] sm:$0xff] }
 0x85c   : > { %3698 = vrot.lane.b32.xlu0 %v3697_v46, %s4015_s6  ;;  %3703 = vrot.lane.b32.xlu1 %v3702_v2, %s4015_s6 }
 0x860   : > { %3708 = vrot.lane.b32.xlu0 %v3707_v55, %s4015_s6  ;;  %3713 = vrot.lane.b32.xlu1 %v3692_v25, %s4016_s14  ;;  %s4023_s6 = smov [#allocation11]  }
 0x861   : > { %s3858_s24 = sshll.u32 %s4023_s6, 4  ;;  %s3859_s24 = int_to_ptr.vmem [resolvable:$false] %s3858_s24 }
 0x862   : > { %s3860_s9 = scalar_lea.vmem %s3859_s24, 1024  ;;  %p3861_p1 = scmp.lt.s32.totalorder %s5636_s25, %s3859_s24 }
 0x863   : > { %p3862_p8 = scmp.lt.s32.totalorder %s3860_s9, %s3854_s30 }
 0x864   : > { %3718 = vrot.lane.b32.xlu0 %v3682_v42, %s4016_s14  ;;  %3723 = vrot.lane.b32.xlu1 %v3687_v44, %s4016_s14 }
 0x865   : > { %p3863_p0 = por %p3862_p8, %p3861_p1 }
 0x867   : > { %p3864_p2 = pnand %p3863_p0, %p3857_p4 }
 0x868   : > { %3733 = vrot.lane.b32.xlu0 %v3702_v2, %s4016_s14  ;;  %3728 = vrot.lane.b32.xlu1 %v3707_v55, %s4016_s14 }
 0x86c   : > { %3738 = vrot.lane.b32.xlu0 %v3697_v46, %s4016_s14  ;;  %2348 = vperm.xlu1 %3441, %v2718_v40   ;;  %s5811_s14 = sld [smem:[#allocation22_spill]] }
 0x870   : > { %2353 = vperm.xlu0 %3440, %v2719_v37   ;;  %2358 = vperm.xlu1 %3441, %v2720_v58  }
 0x872   : > { %s3227_s20 = smul.u32 12, %s5811_s14 }
 0x874   : > { %2363 = vperm.xlu0 %3440, %v2721_v4   ;;  %s2487_s27 = sadd.s32 %s5801_s21, %s3227_s20 }
 0x875   : > { %s2727_s22 = sshll.u32 %s2487_s27, 7 }
 0x876   : > { %s5644_s28 = scalar_lea.hbm %s5813_s4, %s2727_s22 }
 0x8c6   : > { %v3684_v16 = vpop.permute.xlu1 %3683 }
 0x8c7   : > { %v3686_v53 = vunpack.i.h.bf16 %v3684_v16  ;;  %v3685_v34 = vunpack.i.l.bf16 %v3684_v16 }
 0x8c8   : > { %v3694_v15 = vpop.permute.xlu0 %3693 }
 0x8c9   : > { %v3696_v29 = vunpack.i.h.bf16 %v3694_v15  ;;  %v3695_v36 = vunpack.i.l.bf16 %v3694_v15 }
 0x8ca   : > { %v3689_v63 = vpop.permute.xlu1 %3688 }
 0x8cb   : > { %v3691_v14 = vunpack.i.h.bf16 %v3689_v63  ;;  %v3690_v31 = vunpack.i.l.bf16 %v3689_v63 }
 0x8cd   : > { %v2301_v60 = vsel %vm589_vm6, %v3686_v53, %v3691_v14  ;;  %v2300_v19 = vsel %vm589_vm6, %v3685_v34, %v3690_v31  ;;  %v2296_v32 = vsel %vm589_vm6, %v3690_v31, %v3695_v36  ;;  %v2297_v13 = vsel %vm589_vm6, %v3691_v14, %v3696_v29 }
 0x8ce   : > { %v3202_v61 = vpack.c.bf16 %v2301_v60, %v2300_v19  ;;  %v3699_v27 = vpop.permute.xlu0 %3698  ;;  %v3200_v20 = vpack.c.bf16 %v2297_v13, %v2296_v32  ;;  %v3704_v47 = vpop.permute.xlu1 %3703 }
 0x8cf   : > { %v3701_v49 = vunpack.i.h.bf16 %v3699_v27  ;;  %v3700_v18 = vunpack.i.l.bf16 %v3699_v27  ;;  %v3706_v45 = vunpack.i.h.bf16 %v3704_v47  ;;  %v3705_v7 = vunpack.i.l.bf16 %v3704_v47 }
 0x8d0   : > { %3201 = vmatprep.subr.bf16.mxu0 %v3200_v20 }
 0x8d1   : > { %3203 = vmatpush1.bf16.msra.mxu0 %v3202_v61  ;;  %v2298_v54 = vsel %vm589_vm6, %v3700_v18, %v3705_v7  ;;  %v2299_v48 = vsel %vm589_vm6, %v3701_v49, %v3706_v45 }
 0x8d2   : > { %v3709_v28 = vpop.permute.xlu0 %3708  ;;  %v3714_v42 = vpop.permute.xlu1 %3713  ;;  %v3204_v39 = vpack.c.bf16 %v2299_v48, %v2298_v54 }
 0x8d3   : > { %v3711_v43 = vunpack.i.h.bf16 %v3709_v28  ;;  %v3710_v56 = vunpack.i.l.bf16 %v3709_v28  ;;  %v3716_v6 = vunpack.i.h.bf16 %v3714_v42  ;;  %v3715_v57 = vunpack.i.l.bf16 %v3714_v42 }
 0x8d4   : > { %3205 = vmatprep.subr.bf16.mxu0 %v3204_v39 }
 0x8d5   : > { %v2302_v59 = vsel %vm589_vm6, %v3710_v56, %v3700_v18  ;;  %v2303_v8 = vsel %vm589_vm6, %v3711_v43, %v3701_v49 }
 0x8d6   : > { %v3206_v17 = vpack.c.bf16 %v2303_v8, %v2302_v59  ;;  %v3719_v9 = vpop.permute.xlu0 %3718  ;;  %v3724_v25 = vpop.permute.xlu1 %3723 }
 0x8d7   : > { %v3721_v44 = vunpack.i.h.bf16 %v3719_v9  ;;  %v3720_v55 = vunpack.i.l.bf16 %v3719_v9  ;;  %v3725_v0 = vunpack.i.l.bf16 %v3724_v25  ;;  %v3726_v2 = vunpack.i.h.bf16 %v3724_v25 }
 0x8d8   : > { %3207 = vmatpush1.bf16.msra.mxu0 %v3206_v17 }
 0x8d9   : > { %3209 = vmatprep.subr.bf16.mxu0 %v3208_v26  ;;  %v2328_v40 = vsel %vm626_vm8, %v3715_v57, %v3720_v55  ;;  %v2329_v37 = vsel %vm626_vm8, %v3716_v6, %v3721_v44  ;;  %v2332_v41 = vsel %vm626_vm8, %v3725_v0, %v3715_v57  ;;  %v2333_v26 = vsel %vm626_vm8, %v3726_v2, %v3716_v6 }
 0x8da   : > { %v3734_v38 = vpop.permute.xlu0 %3733  ;;  %v3729_v46 = vpop.permute.xlu1 %3728  ;;  %v3216_v63 = vpack.c.bf16 %v2329_v37, %v2328_v40 }
 0x8db   : > { %v3736_v58 = vunpack.i.h.bf16 %v3734_v38  ;;  %v3735_v4 = vunpack.i.l.bf16 %v3734_v38  ;;  %v3731_v16 = vunpack.i.h.bf16 %v3729_v46  ;;  %v3730_v15 = vunpack.i.l.bf16 %v3729_v46 }
 0x8dc   : > { %3211 = vmatpush1.bf16.msra.mxu0 %v3210_v3  ;;  %v3218_v3 = vpack.c.bf16 %v2333_v26, %v2332_v41 }
 0x8dd   : > { %3213 = vmatprep.subr.bf16.mxu0 %v3212_v24  ;;  %v2330_v50 = vsel %vm626_vm8, %v3735_v4, %v3730_v15  ;;  %v2331_v1 = vsel %vm626_vm8, %v3736_v58, %v3731_v16 }
 0x8de   : > { %v3739_v51 = vpop.permute.xlu0 %3738  ;;  %v3220_v24 = vpack.c.bf16 %v2331_v1, %v2330_v50 }
 0x8df   : > { %v3741_v29 = vunpack.i.h.bf16 %v3739_v51  ;;  %v3740_v36 = vunpack.i.l.bf16 %v3739_v51 }
 0x8e0   : > { %3215 = vmatpush1.bf16.msra.mxu0 %v3214_v52  ;;  %v2339_v52 = vld [vmem:[#allocation9 + $0x50] sm:$0xff] }
 0x8e1   : > { %3217 = vmatprep.subr.bf16.mxu0 %v3216_v63  ;;  %v2334_v23 = vsel %vm626_vm8, %v3740_v36, %v3735_v4  ;;  %v2335_v30 = vsel %vm626_vm8, %v3741_v29, %v3736_v58 }
 0x8e2   : > { %v3222_v53 = vpack.c.bf16 %v2335_v30, %v2334_v23 }
 0x8e4   : > { %3219 = vmatpush1.bf16.msra.mxu0 %v3218_v3 }
 0x8e5   : > { %3221 = vmatprep.subr.bf16.mxu0 %v3220_v24 }
 0x8e8   : > { %3223 = vmatpush1.bf16.msra.mxu0 %v3222_v53 }
 0x8eb   : > { %2722 = vmatmul.mubr.msk.f32.vlgmr.msra.gmra.mrb[32].mxu0 %vm667_vm9, %v2337_v62  ;;  %v2349_v14 = vpop.permute.xlu1 %2348 }
 0x8ec   : > { %2447 = vmatprep.mubr.f32.mxu0 %v4017_v10 }
 0x8ef   : > { %2723 = vmatmul.mubr.msk.f32.gmra.mrb[34].mxu0 %vm667_vm9, %v2338_v11  ;;  %v2354_v13 = vpop.permute.xlu0 %2353  ;;  %v2359_v49 = vpop.permute.xlu1 %2358 }
 0x8f0   : > { %2452 = vmatprep.mubr.f32.mxu0 %v4017_v10 }
 0x8f3   : > { %2724 = vmatmul.mubr.msk.f32.gmra.mrb[36].mxu0 %vm667_vm9, %v2339_v52  ;;  %v2364_v48 = vpop.permute.xlu0 %2363 }
 0x8f4   : > { %2457 = vmatprep.mubr.f32.mxu0 %v4017_v10 }
 0x8f7   : > { %2725 = vmatmul.mubr.msk.f32.gmra.mrb[38].mxu0 %vm667_vm9, %v2340_v5 }
 0x9be   : > { %v2444_v34 = vpop.f32.mrb[32].mxu0 }
 0x9bf   : > { %v2445_v31 = vpop.f32.mrb[33].mxu0 }
 0x9c0   : > { %v2446_v60 = vadd.f32 %v2445_v31, %v2349_v14 }
 0x9c2   : > { %v2463_v19 = vsel %vm4451_vm7, %v2446_v60, 0.0  ;;  %v2449_v32 = vpop.f32.mrb[34].mxu0 }
 0x9c3   : > { %v2467_v61 = vadd.f32 %v2463_v19, %v5294_v12  ;;  %v2450_v27 = vpop.f32.mrb[35].mxu0 }
 0x9c4   : > { %v2451_v20 = vadd.f32 %v2450_v27, %v2354_v13 }
 0x9c5   : > { %2471 = vst [vmem:[%s473_s16] sm:$0xff] %v2467_v61 }
 0x9c6   : > { %v2464_v10 = vsel %vm4451_vm7, %v2451_v20, 0.0  ;;  %v2454_v47 = vpop.f32.mrb[36].mxu0 }
 0x9c7   : > { %v2468_v18 = vadd.f32 %v2464_v10, %v5308_v22  ;;  %v2455_v45 = vpop.f32.mrb[37].mxu0 }
 0x9c8   : > { %v2456_v7 = vadd.f32 %v2455_v45, %v2359_v49 }
 0x9c9   : > { %2472 = vst [vmem:[%s473_s16 + $0x8] sm:$0xff] %v2468_v18 }
 0x9ca   : > { %v2465_v12 = vsel %vm4451_vm7, %v2456_v7, 0.0  ;;  %v2459_v54 = vpop.f32.mrb[38].mxu0 }
 0x9cb   : > { %v2469_v28 = vadd.f32 %v2465_v12, %v5325_v33  ;;  %v2460_v42 = vpop.f32.mrb[39].mxu0 }
 0x9cc   : > { %v2461_v39 = vadd.f32 %v2460_v42, %v2364_v48 }
 0x9cd   : > { %2473 = vst [vmem:[%s473_s16 + $0x10] sm:$0xff] %v2469_v28 }
 0x9ce   : > { %v2466_v22 = vsel %vm4451_vm7, %v2461_v39, 0.0 }
 0x9cf   : > { %v2470_v43 = vadd.f32 %v2466_v22, %v5348_v35 }
 0x9d1   : > { %2474 = vst [vmem:[%s473_s16 + $0x18] sm:$0xff] %v2470_v43 }
 0x9d2   : > { %3867 = shalt.err (!%p3864_p2)
}
 0x9d3   : > { %s3868_s10 = scalar_lea.hbm %s5644_s28, 512  ;;  %s3872_s20 = scalar_lea.hbm %s5813_s4, 3072 }
 0x9d4   : > { %p3869_p13 = scmp.ne.s32.totalorder %s5644_s28, %s3868_s10  ;;  %p3873_p9 = scmp.lt.u32.totalorder %s5644_s28, %s5813_s4 }
 0x9d5   : > { %p3874_p7 = scmp.lt.u32.totalorder %s3872_s20, %s3868_s10  ;;  %p3876_p6 = scmp.lt.u32.totalorder %s3868_s10, %s5644_s28 }
 0x9d6   : > { %p3870_p5 = pnand %p3869_p13, %p5814_p12 }
 0x9d7   : > { %p3875_p10 = por %p3874_p7, %p3873_p9 }
 0x9d8   : > { %p3871_p3 = pneg %p3870_p5 }
 0x9d9   : > { %p3877_p11 = por %p3876_p6, %p3875_p10 }
 0x9db   : > { %p3878_p4 = pnand %p3877_p11, %p3871_p3 }
 0x9dd   : > { %3881 = shalt.err (!%p3878_p4)
}
 0x9de   : > { %s4024_s21 = smov 128   ;;  %s4025_s19 = smov 384  }
 0x9df   : > { %s4026_s30 = smov 8  }
 0x9e0   : > { %3240 = dma.vmem_to_hbm [thread:$0]  (%p5814_p12), %s5636_s25, 512, %s5644_s28, %s2476_s7, %s4024_s21, %s4025_s19, %s4026_s30  }
 0x9e1 PF: > { %s5815_s6 = sld [smem:[#allocation18_spill]]  ;;  %p3257_p1 = scmp.ge.s32.totalorder %s4004_s13, 2 }
 0x9e2   : > { %s5816_s24 = sld [smem:[#allocation32_spill]] }
 0x9e7   : > { %s2505_s9 = sand.u32 1, %s5815_s6  }
 0x9e8   : > { %p5817_p8 = scmp.ne.s32.totalorder %s5816_s24, 0  ;;  %s2506_s10 = scalar_lea.sflag [#allocation5], %s2505_s9 }
 0x9ea   : > { %p3250_p0 = pnand %p3257_p1, %p5817_p8 }
 0x9ec   : > { %3951 = dma.done.wait (!%p3250_p0), %s2506_s10, 512  }
 0x9ed   : > { %3953 = vsyncadd (!%p3250_p0), %s2506_s10, 4294966784  ;;  %s27_s13 = sadd.s32 1, %s4004_s13   ;;  %s5819_s24 = sld [smem:[#allocation17_spill]] }
 0x9ee   : > { %p5675_p2 = scmp.ge.s32.totalorder %s27_s13, 8   ;;  %s5820_s18 = sld [smem:[#allocation30_spill]] }
 0x9ef   : > { %s5821_s27 = sld [smem:[#allocation19_spill]]  ;;  %s5822_s15 = sld [smem:[#allocation27_spill]] }
 0x9f0   : > { %s5823_s7 = sld [smem:[#allocation26_spill]]  ;;  %s5824_s16 = sld [smem:[#allocation24_spill]] }
 0x9f1   : > { %s5825_s20 = sld [smem:[#allocation25_spill]]  ;;  %s5826_s25 = smov %s3964_s26 }
 0x9f2   : > { %s5828_s28 = smov %s3976_s29  ;;  %s5830_s30 = smov %s3984_s8 }
 0x9f3   : > { %s5832_s9 = smov %s3996_s11  ;;  %s5833_s10 = smov %s4000_s12 }
 0x9f4   : > { %s5827_s26 = smov %s5820_s18  ;;  %26 = sbr.rel (!%p5675_p2) target bundleno = 17 (0x11), region = 168 }
 0x9f5   : > { %s5829_s29 = smov %s5822_s15 }
 0x9f6   : > { %s5831_s8 = smov %s5823_s7  ;;  %s5834_s11 = smov %s5824_s16 }
 0x9f7   : > { %s5835_s12 = smov %s5825_s20 }
 0x9fb   :  { %2511 = vsyncpa [#allocation4], 1 }
 0x9fc   :  { %2513 = vsyncpa [#allocation4 + $0x1], 1 }
 0x9fd   :  { %2514 = vsyncpa [#allocation7], 1 }
 0x9fe   :  { %2516 = vsyncpa [#allocation7 + $0x1], 1 }
 0x9ff   :  { %2517 = vsyncpa [#allocation10], 1 }
 0xa00   :  { %2518 = vsyncpa [#allocation5], 1 }
 0xa01   :  { %2520 = vsyncpa [#allocation5 + $0x1], 1 }

</bundles_post_ra>
